<compile_context>
chip_gen: v7x
topology: tpu7x:2x2x1
jax: 0.10.0
libtpu: 0.0.40
codegen_flags: <defaults>
</compile_context>

<pallas_src>
import jax
import jax.numpy as jnp
from jax.experimental import pallas as pl
from jax.experimental.pallas import tpu as pltpu

IN_DIM = 2048
HID_DIM = 512
LATENT_DIMS = 32


def _vae_encoder_kernel(x_ref, w1t_ref, b1_ref, w23t_ref, b23_ref, eps_ref,
                        z_ref, kl_ref):
    # linear1 + relu: bf16 operands on the MXU, f32 accumulation, f32 epilogue.
    h = jnp.dot(x_ref[...], w1t_ref[...],
                preferred_element_type=jnp.float32) + b1_ref[...]
    h = jnp.maximum(h, 0.0)

    # Fused linear2|linear3: one (1,512) @ (512,64) matmul, then slice.
    mo = jnp.dot(h.astype(jnp.bfloat16), w23t_ref[...],
                 preferred_element_type=jnp.float32) + b23_ref[...]
    mu = mo[:, :LATENT_DIMS]
    log_sigma = mo[:, LATENT_DIMS:]
    sigma = jnp.exp(log_sigma)

    # Reparameterization: z = mu + sigma * eps
    z_ref[...] = mu + sigma * eps_ref[...]

    # KL = sum(sigma^2 + mu^2 - log(sigma) - 1/2), using log_sigma directly
    # (sigma*sigma == exp(2*log_sigma); avoids a redundant EUP log and -inf).
    kl = jnp.sum(sigma * sigma + mu * mu - log_sigma - 0.5, keepdims=True)
    kl_ref[...] = kl.reshape(1, 1)


def prepare_params(params):
    """One-time conversion to kernel layout (NOT in the per-call path)."""
    w1t = params["w1"].T.astype(jnp.bfloat16)                      # (2048, 512)
    b1 = params["b1"].reshape(1, HID_DIM).astype(jnp.float32)      # (1, 512)
    w23t = jnp.concatenate([params["w2"], params["w3"]],
                           axis=0).T.astype(jnp.bfloat16)          # (512, 64)
    b23 = jnp.concatenate([params["b2"], params["b3"]]
                          ).reshape(1, 2 * LATENT_DIMS).astype(jnp.float32)
    return dict(w1t=w1t, b1=b1, w23t=w23t, b23=b23)


def vae_encoder_forward(x, prepped, eps):
    """x: any shape with 2048 total elements (e.g. NCHW [2,4,16,16]).
    prepped: output of prepare_params(). eps: (latent,) standard-normal noise.
    Returns (z, kl) matching the PyTorch forward (z: (latent,), kl: scalar)."""
    x_flat = x.reshape(1, IN_DIM).astype(jnp.bfloat16)
    eps2 = eps.reshape(1, LATENT_DIMS).astype(jnp.float32)

    vmem = pl.BlockSpec(memory_space=pltpu.MemorySpace.VMEM)
    cost = pl.CostEstimate(
        flops=2 * IN_DIM * HID_DIM + 2 * HID_DIM * 2 * LATENT_DIMS,
        transcendentals=LATENT_DIMS,
        bytes_accessed=(IN_DIM * HID_DIM * 2            # W1 (bf16)
                        + IN_DIM * 2                    # x (bf16)
                        + HID_DIM * 4                   # b1
                        + HID_DIM * 2 * LATENT_DIMS * 2 # W2|W3 (bf16)
                        + 2 * LATENT_DIMS * 4           # b2|b3
                        + LATENT_DIMS * 4               # eps
                        + LATENT_DIMS * 4               # z
                        + 4),                           # kl
    )

    z, kl = pl.pallas_call(
        _vae_encoder_kernel,
        out_shape=(
            jax.ShapeDtypeStruct((1, LATENT_DIMS), jnp.float32),
            jax.ShapeDtypeStruct((1, 1), jnp.float32),
        ),
        in_specs=[vmem] * 6,
        out_specs=(vmem, vmem),
        cost_estimate=cost,
    )(x_flat, prepped["w1t"], prepped["b1"],
      prepped["w23t"], prepped["b23"], eps2)
    return z.reshape(LATENT_DIMS), kl[0, 0]


def init_params(key):
    """Deterministic init mimicking nn.Linear defaults (U[-1/sqrt(fan_in), +])."""
    k1, k2, k3, k4, k5, k6 = jax.random.split(key, 6)

    def lin(kw, kb, fan_in, fan_out):
        bound = 1.0 / jnp.sqrt(fan_in)
        w = jax.random.uniform(kw, (fan_out, fan_in), jnp.float32, -bound, bound)
        b = jax.random.uniform(kb, (fan_out,), jnp.float32, -bound, bound)
        return w, b

    w1, b1 = lin(k1, k2, IN_DIM, HID_DIM)
    w2, b2 = lin(k3, k4, HID_DIM, LATENT_DIMS)
    w3, b3 = lin(k5, k6, HID_DIM, LATENT_DIMS)
    return dict(w1=w1, b1=b1, w2=w2, b2=b2, w3=w3, b3=b3)


def reference_forward(x, params, eps):
    """Pure-JAX f32 reference for a sanity check."""
    xf = x.reshape(-1).astype(jnp.float32)
    h = jnp.maximum(params["w1"] @ xf + params["b1"], 0.0)
    mu = params["w2"] @ h + params["b2"]
    sigma = jnp.exp(params["w3"] @ h + params["b3"])
    z = mu + sigma * eps
    kl = jnp.sum(sigma ** 2 + mu ** 2 - jnp.log(sigma) - 0.5)
    return z, kl


if __name__ == "__main__":
    key = jax.random.PRNGKey(0)
    kx, kp, ke = jax.random.split(key, 3)

    # NCHW input whose total size is 2048 (the module's linear1 requires it).
    x = jax.random.normal(kx, (2, 4, 16, 16), jnp.float32)
    params = init_params(kp)
    prepped = prepare_params(params)   # one-time weight layout/dtype prep
    # Standard-normal noise (stands in for self.N.sample(mu.shape)).
    eps = jax.random.normal(ke, (LATENT_DIMS,), jnp.float32)

    fwd = jax.jit(vae_encoder_forward)
    z, kl = fwd(x, prepped, eps)
    jax.block_until_ready((z, kl))

    z_ref, kl_ref = reference_forward(x, params, eps)
    # bf16 weights/activations on the MXU -> loosened tolerances vs pure f32.
    assert jnp.allclose(z, z_ref, atol=3e-2, rtol=3e-2), (z, z_ref)
    assert jnp.allclose(kl, kl_ref, atol=5e-1, rtol=3e-2), (kl, kl_ref)

    print("KERNEL_OK")
</pallas_src>

<mosaic_0001>
module attributes {stable_mosaic.version = 11 : i64} {
  func.func @_vae_encoder_kernel(%arg0: memref<1x2048xbf16, #tpu.memory_space<vmem>>, %arg1: memref<2048x512xbf16, #tpu.memory_space<vmem>>, %arg2: memref<1x512xf32, #tpu.memory_space<vmem>>, %arg3: memref<512x64xbf16, #tpu.memory_space<vmem>>, %arg4: memref<1x64xf32, #tpu.memory_space<vmem>>, %arg5: memref<1x32xf32, #tpu.memory_space<vmem>>, %arg6: memref<1x32xf32, #tpu.memory_space<vmem>>, %arg7: memref<1x1xf32, #tpu.memory_space<vmem>>) attributes {dimension_semantics = [], scalar_prefetch = 0 : i64, scratch_operands = 0 : i64, tpu.core_type = #tpu.core_type<tc>} {
    %c0 = arith.constant 0 : index
    %c0_0 = arith.constant 0 : index
    %0 = vector.load %arg0[%c0, %c0_0] : memref<1x2048xbf16, #tpu.memory_space<vmem>>, vector<1x2048xbf16>
    %c0_1 = arith.constant 0 : index
    %c0_2 = arith.constant 0 : index
    %1 = vector.load %arg1[%c0_1, %c0_2] : memref<2048x512xbf16, #tpu.memory_space<vmem>>, vector<2048x512xbf16>
    %cst = arith.constant dense<0.000000e+00> : vector<1x512xf32>
    %2 = tpu.matmul %0, %1, %cst {dimension_numbers = #tpu.dot_dimension_numbers<[1], [0], [0], [1], [0, 0, 1, 1], [], []>} : vector<1x2048xbf16>, vector<2048x512xbf16>, vector<1x512xf32> -> vector<1x512xf32>
    %c0_3 = arith.constant 0 : index
    %c0_4 = arith.constant 0 : index
    %3 = vector.load %arg2[%c0_3, %c0_4] : memref<1x512xf32, #tpu.memory_space<vmem>>, vector<1x512xf32>
    %4 = arith.addf %2, %3 : vector<1x512xf32>
    %cst_5 = arith.constant 0.000000e+00 : f32
    %5 = vector.broadcast %cst_5 : f32 to vector<1x512xf32>
    %6 = arith.maximumf %4, %5 : vector<1x512xf32>
    %7 = arith.truncf %6 : vector<1x512xf32> to vector<1x512xbf16>
    %c0_6 = arith.constant 0 : index
    %c0_7 = arith.constant 0 : index
    %8 = vector.load %arg3[%c0_6, %c0_7] : memref<512x64xbf16, #tpu.memory_space<vmem>>, vector<512x64xbf16>
    %cst_8 = arith.constant dense<0.000000e+00> : vector<1x64xf32>
    %9 = tpu.matmul %7, %8, %cst_8 {dimension_numbers = #tpu.dot_dimension_numbers<[1], [0], [0], [1], [0, 0, 1, 1], [], []>} : vector<1x512xbf16>, vector<512x64xbf16>, vector<1x64xf32> -> vector<1x64xf32>
    %c0_9 = arith.constant 0 : index
    %c0_10 = arith.constant 0 : index
    %10 = vector.load %arg4[%c0_9, %c0_10] : memref<1x64xf32, #tpu.memory_space<vmem>>, vector<1x64xf32>
    %11 = arith.addf %9, %10 : vector<1x64xf32>
    %12 = vector.extract_strided_slice %11 {offsets = [0, 0], sizes = [1, 32], strides = [1, 1]} : vector<1x64xf32> to vector<1x32xf32>
    %13 = vector.extract_strided_slice %11 {offsets = [0, 32], sizes = [1, 32], strides = [1, 1]} : vector<1x64xf32> to vector<1x32xf32>
    %14 = math.exp %13 : vector<1x32xf32>
    %c0_11 = arith.constant 0 : index
    %c0_12 = arith.constant 0 : index
    %15 = vector.load %arg5[%c0_11, %c0_12] : memref<1x32xf32, #tpu.memory_space<vmem>>, vector<1x32xf32>
    %16 = arith.mulf %14, %15 : vector<1x32xf32>
    %17 = arith.addf %12, %16 : vector<1x32xf32>
    %c0_13 = arith.constant 0 : index
    %c0_14 = arith.constant 0 : index
    %18 = vector.load %arg6[%c0_13, %c0_14] : memref<1x32xf32, #tpu.memory_space<vmem>>, vector<1x32xf32>
    tpu.vector_store %arg6[%c0_13, %c0_14], %17 {strides = array<i32>} : memref<1x32xf32, #tpu.memory_space<vmem>>, vector<1x32xf32>,
    %19 = arith.mulf %14, %14 : vector<1x32xf32>
    %20 = arith.mulf %12, %12 : vector<1x32xf32>
    %21 = arith.addf %19, %20 : vector<1x32xf32>
    %22 = arith.subf %21, %13 : vector<1x32xf32>
    %cst_15 = arith.constant 5.000000e-01 : f32
    %23 = vector.broadcast %cst_15 : f32 to vector<1x32xf32>
    %24 = arith.subf %22, %23 : vector<1x32xf32>
    %25 = vector.shape_cast %24 : vector<1x32xf32> to vector<1x1x32xf32>
    %cst_16 = arith.constant dense<0.000000e+00> : vector<1xf32>
    %26 = vector.multi_reduction <add>, %25, %cst_16 [1, 2] : vector<1x1x32xf32> to vector<1xf32>
    %27 = vector.shape_cast %26 : vector<1xf32> to vector<1x1x1xf32>
    %28 = vector.extract %27[0, 0, 0] : f32 from vector<1x1x1xf32>
    %29 = vector.broadcast %28 : f32 to vector<1x1xf32>
    %c0_17 = arith.constant 0 : index
    %c0_18 = arith.constant 0 : index
    %30 = vector.load %arg7[%c0_17, %c0_18] : memref<1x1xf32, #tpu.memory_space<vmem>>, vector<1x1xf32>
    tpu.vector_store %arg7[%c0_17, %c0_18], %29 {strides = array<i32>} : memref<1x1xf32, #tpu.memory_space<vmem>>, vector<1x1xf32>,
    return
  }
}

</mosaic_0001>

<bundles_post_ra>
// kernel: vae_encoder_forward.1
= control target key start
LH: loop header
LB: loop body
LE: loop exit
PB: predicated region body
PF: predicated region fallthrough
CT: control target
= control target key end

     0   :  { %13 = vsyncpa [#allocation3], 0  ;;  %s6297_s0 = inlined_call_operand.vmem [shape: bf16[1,2048], index: 0, kind: input, shape index: {}]   ;;  %s6298_s1 = inlined_call_operand.hbm [shape: bf16[2048,512], index: 1, kind: input, shape index: {}]   ;;  %s6299_s2 = inlined_call_operand.hbm [shape: f32[1,512], index: 2, kind: input, shape index: {}]   ;;  %s6300_s3 = inlined_call_operand.vmem [shape: bf16[512,64], index: 3, kind: input, shape index: {}]   ;;  %s6301_s4 = inlined_call_operand.hbm [shape: f32[1,64], index: 4, kind: input, shape index: {}]   ;;  %s6302_s5 = inlined_call_operand.hbm [shape: f32[1,32], index: 5, kind: input, shape index: {}]   ;;  %s6303_s6 = inlined_call_operand.hbm [shape: f32[1,32], index: 6, kind: output, shape index: {0}]   ;;  %s6304_s7 = inlined_call_operand.hbm [shape: f32[1,1], index: 7, kind: output, shape index: {1}]  }
   0x1   :  { %14 = vsyncpa [#allocation6], 0 }
   0x2   :  { %15 = vsyncpa [#allocation9], 0 }
   0x3   :  { %16 = vsyncpa [#allocation4], 0 }
   0x4   :  { %17 = vsyncpa [#allocation12], 0  ;;  %s5975_s24 = smov [#allocation5]   ;;  %s5976_s26 = smov [#allocation2]  }
   0x5   :  { %s38_s25 = sshll.u32 %s5975_s24, 4  ;;  %s25_s27 = sshll.u32 %s5976_s26, 4  ;;  %s39_s25 = int_to_ptr.vmem [resolvable:$true] %s38_s25  ;;  %s6026_s27 = int_to_ptr.vmem [resolvable:$true] %s25_s27 }
   0x6   :  { %s5833_s30 = scalar_lea.hbm %s6299_s2, 64 }
   0x7   :  { %p5834_p0 = scmp.ne.s32.totalorder %s6299_s2, %s5833_s30  ;;  %p5837_p1 = scmp.lt.u32.totalorder %s5833_s30, %s6299_s2 }
   0x9   :  { %p5839_p2 = pnand %p5837_p1, %p5834_p0 }
   0xb   :  { %5842 = shalt.err (!%p5839_p2)
}
   0xc   :  { %s5843_s12 = scalar_lea.vmem %s39_s25, 64  ;;  %p5848_p4 = scmp.lt.s32.totalorder %s39_s25, %s39_s25 }
   0xd   :  { %p5844_p3 = scmp.ne.s32.totalorder %s39_s25, %s5843_s12  ;;  %p5849_p5 = scmp.lt.s32.totalorder %s5843_s12, %s5843_s12 }
   0xf   :  { %p5850_p6 = por %p5849_p5, %p5848_p4 }
  0x11   :  { %p5851_p7 = pnand %p5850_p6, %p5844_p3 }
  0x13   :  { %5854 = shalt.err (!%p5851_p7)
}
  0x14   :  { %41 = dma.hbm_to_vmem [thread:$0]  %s6299_s2, 64, %s39_s25, [#allocation6]  }
  0x15   :  { %s5855_s17 = scalar_lea.hbm %s6298_s1, 65536 }
  0x16   :  { %p5856_p8 = scmp.ne.s32.totalorder %s6298_s1, %s5855_s17  ;;  %p5859_p9 = scmp.lt.u32.totalorder %s5855_s17, %s6298_s1 }
  0x18   :  { %p5861_p10 = pnand %p5859_p9, %p5856_p8 }
  0x1a   :  { %5864 = shalt.err (!%p5861_p10)
}
  0x1b   :  { %s5865_s22 = scalar_lea.vmem %s6026_s27, 65536  ;;  %p5870_p12 = scmp.lt.s32.totalorder %s6026_s27, %s6026_s27 }
  0x1c   :  { %p5866_p11 = scmp.ne.s32.totalorder %s6026_s27, %s5865_s22  ;;  %p5871_p13 = scmp.lt.s32.totalorder %s5865_s22, %s5865_s22 }
  0x1e   :  { %p5872_p0 = por %p5871_p13, %p5870_p12 }
  0x20   :  { %p5873_p1 = pnand %p5872_p0, %p5866_p11 }
  0x22   :  { %5876 = shalt.err (!%p5873_p1)
}
  0x23   :  { %s5977_s2 = smov 256   ;;  %s5978_s23 = smov 16  }
  0x24   :  { %31 = dma.hbm_to_vmem [thread:$0]  %s6298_s1, 65536, %s6026_s27, [#allocation3], %s5977_s2, %s5977_s2, %s5978_s23  }
  0x25   :  { %s5979_s26 = smov [#allocation7]   ;;  %s5980_s29 = smov [#allocation8]  }
  0x26   :  { %s50_s28 = sshll.u32 %s5979_s26, 4  ;;  %s60_s30 = sshll.u32 %s5980_s29, 4  ;;  %s51_s28 = int_to_ptr.vmem [resolvable:$true] %s50_s28  ;;  %s61_s30 = int_to_ptr.vmem [resolvable:$true] %s60_s30 }
  0x27   :  { %s5877_s10 = scalar_lea.hbm %s6301_s4, 16 }
  0x28   :  { %p5878_p2 = scmp.ne.s32.totalorder %s6301_s4, %s5877_s10  ;;  %p5881_p3 = scmp.lt.u32.totalorder %s5877_s10, %s6301_s4 }
  0x2a   :  { %p5883_p4 = pnand %p5881_p3, %p5878_p2 }
  0x2c   :  { %5886 = shalt.err (!%p5883_p4)
}
  0x2d   :  { %s5887_s1 = scalar_lea.vmem %s51_s28, 16  ;;  %s5891_s27 = scalar_lea.vmem %s51_s28, 32 }
  0x2e   :  { %p5888_p5 = scmp.ne.s32.totalorder %s51_s28, %s5887_s1  ;;  %p5892_p6 = scmp.lt.s32.totalorder %s51_s28, %s51_s28 }
  0x2f   :  { %p5893_p7 = scmp.lt.s32.totalorder %s5891_s27, %s5887_s1 }
  0x31   :  { %p5894_p8 = por %p5893_p7, %p5892_p6 }
  0x33   :  { %p5895_p9 = pnand %p5894_p8, %p5888_p5 }
  0x35   :  { %5898 = shalt.err (!%p5895_p9)
}
  0x36   :  { %53 = dma.hbm_to_vmem [thread:$0]  %s6301_s4, 16, %s51_s28, [#allocation6]  }
  0x37   :  { %s5899_s19 = scalar_lea.hbm %s6302_s5, 16 }
  0x38   :  { %p5900_p10 = scmp.ne.s32.totalorder %s6302_s5, %s5899_s19  ;;  %p5903_p11 = scmp.lt.u32.totalorder %s5899_s19, %s6302_s5 }
  0x3a   :  { %p5905_p12 = pnand %p5903_p11, %p5900_p10 }
  0x3c   :  { %5908 = shalt.err (!%p5905_p12)
}
  0x3d   :  { %s5909_s23 = scalar_lea.vmem %s61_s30, 16  ;;  %s5913_s24 = scalar_lea.vmem %s61_s30, 32 }
  0x3e   :  { %p5910_p13 = scmp.ne.s32.totalorder %s61_s30, %s5909_s23  ;;  %p5914_p0 = scmp.lt.s32.totalorder %s61_s30, %s61_s30 }
  0x3f   :  { %p5915_p1 = scmp.lt.s32.totalorder %s5913_s24, %s5909_s23 }
  0x41   :  { %p5916_p2 = por %p5915_p1, %p5914_p0 }
  0x43   :  { %p5917_p3 = pnand %p5916_p2, %p5910_p13 }
  0x45   :  { %5920 = shalt.err (!%p5917_p3)
}
  0x46   :  { %63 = dma.hbm_to_vmem [thread:$0]  %s6302_s5, 16, %s61_s30, [#allocation9]  }
  0x47   :  { %5965 = dma.done.wait [#allocation3], 65536  }
  0x48   :  { %5966 = vsyncadd [#allocation3], 4294901760 }
  0x49   :  { %5967 = dma.done.wait [#allocation6], 80  }
  0x4a   :  { %5968 = vsyncadd [#allocation6], 4294967216 }
  0x4b   :  { %5969 = dma.done.wait [#allocation9], 16  }
  0x4c   :  { %5970 = vsyncadd [#allocation9], 4294967280  ;;  %v5029_v0 = vld [vmem:[#allocation2 + $0x4] ss:$16 sps:$4 sm:$0xff]   ;;  %v5031_v1 = vld [vmem:[#allocation2 + $0xc] ss:$16 sps:$4 sm:$0xff]   ;;  %v598_v38 = vlaneseq }
  0x4d   :  { %3289 = vmatprep.subr.bf16.mxu0 %v5029_v0  ;;  %v5033_v2 = vld [vmem:[#allocation2] ss:$16 sps:$4 sm:$0xff]   ;;  %v5034_v3 = vld [vmem:[#allocation2 + $0x8] ss:$16 sps:$4 sm:$0xff]   ;;  %3617 = vmatprep.subr.bf16.mxu1 %v5031_v1  ;;  %v5035_v4 = vld [vmem:[#allocation2 + $0x24] ss:$16 sps:$4 sm:$0xff]  }
  0x4e   :  { %3290 = vmatpush1.bf16.msra.mxu0 %v5033_v2  ;;  %3618 = vmatpush1.bf16.msra.mxu1 %v5034_v3  ;;  %v5037_v5 = vld [vmem:[#allocation2 + $0x2c] ss:$16 sps:$4 sm:$0xff]   ;;  %v5039_v6 = vld [vmem:[#allocation2 + $0x20] ss:$16 sps:$4 sm:$0xff]   ;;  %v5040_v7 = vld [vmem:[#allocation2 + $0x28] ss:$16 sps:$4 sm:$0xff]  }
  0x4f   :  { %3291 = vmatprep.subr.bf16.mxu0 %v5035_v4  ;;  %3619 = vmatprep.subr.bf16.mxu1 %v5037_v5  ;;  %v5041_v8 = vld [vmem:[#allocation2 + $0x44] ss:$16 sps:$4 sm:$0xff]   ;;  %v5043_v9 = vld [vmem:[#allocation2 + $0x4c] ss:$16 sps:$4 sm:$0xff]   ;;  %v5045_v10 = vld [vmem:[#allocation2 + $0x40] ss:$16 sps:$4 sm:$0xff]  }
  0x50   :  { %v5046_v11 = vld [vmem:[#allocation2 + $0x48] ss:$16 sps:$4 sm:$0xff]   ;;  %v5047_v12 = vld [vmem:[#allocation2 + $0x64] ss:$16 sps:$4 sm:$0xff]   ;;  %v5049_v13 = vld [vmem:[#allocation2 + $0x6c] ss:$16 sps:$4 sm:$0xff]  }
  0x51   :  { %v5051_v14 = vld [vmem:[#allocation2 + $0x60] ss:$16 sps:$4 sm:$0xff]   ;;  %v5052_v15 = vld [vmem:[#allocation2 + $0x68] ss:$16 sps:$4 sm:$0xff]   ;;  %v5053_v16 = vld [vmem:[#allocation2 + $0x84] ss:$16 sps:$4 sm:$0xff]  }
  0x52   :  { %3292 = vmatpush1.bf16.msra.mxu0 %v5039_v6  ;;  %3620 = vmatpush1.bf16.msra.mxu1 %v5040_v7  ;;  %v5055_v17 = vld [vmem:[#allocation2 + $0x8c] ss:$16 sps:$4 sm:$0xff]   ;;  %v5057_v18 = vld [vmem:[#allocation2 + $0x80] ss:$16 sps:$4 sm:$0xff]   ;;  %v5058_v19 = vld [vmem:[#allocation2 + $0x88] ss:$16 sps:$4 sm:$0xff]  }
  0x53   :  { %3293 = vmatprep.subr.bf16.mxu0 %v5041_v8  ;;  %3621 = vmatprep.subr.bf16.mxu1 %v5043_v9  ;;  %v5059_v20 = vld [vmem:[#allocation2 + $0xa4] ss:$16 sps:$4 sm:$0xff]   ;;  %v5061_v21 = vld [vmem:[#allocation2 + $0xac] ss:$16 sps:$4 sm:$0xff]   ;;  %v5063_v22 = vld [vmem:[#allocation2 + $0xa0] ss:$16 sps:$4 sm:$0xff]  }
  0x54   :  { %v5064_v23 = vld [vmem:[#allocation2 + $0xa8] ss:$16 sps:$4 sm:$0xff]   ;;  %v5065_v24 = vld [vmem:[#allocation2 + $0xc4] ss:$16 sps:$4 sm:$0xff]   ;;  %v5067_v25 = vld [vmem:[#allocation2 + $0xcc] ss:$16 sps:$4 sm:$0xff]  }
  0x55   :  { %v5069_v26 = vld [vmem:[#allocation2 + $0xc0] ss:$16 sps:$4 sm:$0xff]   ;;  %v5070_v27 = vld [vmem:[#allocation2 + $0xc8] ss:$16 sps:$4 sm:$0xff]   ;;  %v5071_v28 = vld [vmem:[#allocation2 + $0xe4] ss:$16 sps:$4 sm:$0xff]  }
  0x56   :  { %3294 = vmatpush1.bf16.msra.mxu0 %v5045_v10  ;;  %3622 = vmatpush1.bf16.msra.mxu1 %v5046_v11  ;;  %v5073_v29 = vld [vmem:[#allocation2 + $0xec] ss:$16 sps:$4 sm:$0xff]   ;;  %v5075_v30 = vld [vmem:[#allocation2 + $0xe0] ss:$16 sps:$4 sm:$0xff]   ;;  %v5076_v31 = vld [vmem:[#allocation2 + $0xe8] ss:$16 sps:$4 sm:$0xff]  }
  0x57   :  { %3295 = vmatprep.subr.bf16.mxu0 %v5047_v12  ;;  %3623 = vmatprep.subr.bf16.mxu1 %v5049_v13  ;;  %v5077_v32 = vld [vmem:[#allocation2 + $0x104] ss:$16 sps:$4 sm:$0xff]   ;;  %v5079_v33 = vld [vmem:[#allocation2 + $0x10c] ss:$16 sps:$4 sm:$0xff]   ;;  %v5081_v34 = vld [vmem:[#allocation2 + $0x100] ss:$16 sps:$4 sm:$0xff]  }
  0x58   :  { %v5082_v35 = vld [vmem:[#allocation2 + $0x108] ss:$16 sps:$4 sm:$0xff]   ;;  %v5981_v36 = vmov 1966171168   ;;  %v5083_v39 = vld [vmem:[#allocation2 + $0x124] ss:$16 sps:$4 sm:$0xff]  }
  0x59   :  { %v596_v37 = vunpack.c.l.s4 %v5981_v36  ;;  %v5085_v40 = vld [vmem:[#allocation2 + $0x12c] ss:$16 sps:$4 sm:$0xff]   ;;  %v5087_v41 = vld [vmem:[#allocation2 + $0x120] ss:$16 sps:$4 sm:$0xff]   ;;  %v6081_v43 = vshrl.u32 %v598_v38, 7  ;;  %s5983_s14 = smov 96  }
  0x5a   :  { %3296 = vmatpush1.bf16.msra.mxu0 %v5051_v14  ;;  %3624 = vmatpush1.bf16.msra.mxu1 %v5052_v15  ;;  %v5088_v44 = vld [vmem:[#allocation2 + $0x128] ss:$16 sps:$4 sm:$0xff]   ;;  %v5089_v45 = vld [vmem:[#allocation2 + $0x144] ss:$16 sps:$4 sm:$0xff]   ;;  %v5091_v46 = vld [vmem:[#allocation2 + $0x14c] ss:$16 sps:$4 sm:$0xff]  }
  0x5b   :  { %3297 = vmatprep.subr.bf16.mxu0 %v5053_v16  ;;  %3625 = vmatprep.subr.bf16.mxu1 %v5055_v17  ;;  %v597_v42 = vunpack.c.0.s8 %v596_v37  ;;  %v5093_v47 = vld [vmem:[#allocation2 + $0x140] ss:$16 sps:$4 sm:$0xff]   ;;  %v5094_v48 = vld [vmem:[#allocation2 + $0x148] ss:$16 sps:$4 sm:$0xff]   ;;  %v5095_v50 = vld [vmem:[#allocation2 + $0x164] ss:$16 sps:$4 sm:$0xff]  }
  0x5c   :  { %v5097_v51 = vld [vmem:[#allocation2 + $0x16c] ss:$16 sps:$4 sm:$0xff]   ;;  %v6089_v52 = vld [vmem:[%s6297_s0] sm:$0xff]  ;;  %v5100_v55 = vld [vmem:[#allocation2 + $0x168] ss:$16 sps:$4 sm:$0xff]   ;;  %vm4307_vm0 = vcmask 253952  }
  0x5d   :  { %v6084_v49 = vsub.s32 %v597_v42, %v6081_v43  ;;  %v5099_v53 = vld [vmem:[#allocation2 + $0x160] ss:$16 sps:$4 sm:$0xff]   ;;  %v5101_v56 = vld [vmem:[#allocation2 + $0x184] ss:$16 sps:$4 sm:$0xff]   ;;  %v5103_v57 = vld [vmem:[#allocation2 + $0x18c] ss:$16 sps:$4 sm:$0xff]  }
  0x5e   :  { %3298 = vmatpush1.bf16.msra.mxu0 %v5057_v18  ;;  %3626 = vmatpush1.bf16.msra.mxu1 %v5058_v19  ;;  %v5105_v59 = vld [vmem:[#allocation2 + $0x180] ss:$16 sps:$4 sm:$0xff]   ;;  %v5106_v61 = vld [vmem:[#allocation2 + $0x188] ss:$16 sps:$4 sm:$0xff]   ;;  %v5107_v62 = vld [vmem:[#allocation2 + $0x1a4] ss:$16 sps:$4 sm:$0xff]  }
  0x5f   :  { %3299 = vmatprep.subr.bf16.mxu0 %v5059_v20  ;;  %3627 = vmatprep.subr.bf16.mxu1 %v5061_v21  ;;  %v601_v54 = vrot.slane %v6089_v52, %v6084_v49  ;;  %v5109_v63 = vld [vmem:[#allocation2 + $0x1ac] ss:$16 sps:$4 sm:$0xff]   ;;  %v5111_v0 = vld [vmem:[#allocation2 + $0x1a0] ss:$16 sps:$4 sm:$0xff]   ;;  %v5112_v1 = vld [vmem:[#allocation2 + $0x1a8] ss:$16 sps:$4 sm:$0xff]  }
  0x60   :  { %v5113_v2 = vld [vmem:[#allocation2 + $0x1c4] ss:$16 sps:$4 sm:$0xff]   ;;  %v5115_v3 = vld [vmem:[#allocation2 + $0x1cc] ss:$16 sps:$4 sm:$0xff]   ;;  %v5117_v4 = vld [vmem:[#allocation2 + $0x1c0] ss:$16 sps:$4 sm:$0xff]  }
  0x61   :  { %v609_v58 = vcombine.high %v601_v54, %v601_v54  ;;  %v5118_v5 = vld [vmem:[#allocation2 + $0x1c8] ss:$16 sps:$4 sm:$0xff]   ;;  %v5119_v6 = vld [vmem:[#allocation2 + $0x1e4] ss:$16 sps:$4 sm:$0xff]   ;;  %v5121_v7 = vld [vmem:[#allocation2 + $0x1ec] ss:$16 sps:$4 sm:$0xff]   ;;  %v6095_v13 = vrot.slane %v601_v54, %v6084_v49 }
  0x62   :  { %3300 = vmatpush1.bf16.msra.mxu0 %v5063_v22  ;;  %3628 = vmatpush1.bf16.msra.mxu1 %v5064_v23  ;;  %v5123_v8 = vld [vmem:[#allocation2 + $0x1e0] ss:$16 sps:$4 sm:$0xff]   ;;  %v5124_v9 = vld [vmem:[#allocation2 + $0x1e8] ss:$16 sps:$4 sm:$0xff]   ;;  %v5127_v10 = vld [vmem:[#allocation2 + $0x204] ss:$16 sps:$4 sm:$0xff]  }
  0x63   :  { %3301 = vmatprep.subr.bf16.mxu0 %v5065_v24  ;;  %3629 = vmatprep.subr.bf16.mxu1 %v5067_v25  ;;  %v631_v60 = vrot.slane %v609_v58, %v6084_v49  ;;  %v5130_v11 = vld [vmem:[#allocation2 + $0x20c] ss:$16 sps:$4 sm:$0xff]   ;;  %v5125_v12 = vld [vmem:[#allocation2 + $0x200] ss:$16 sps:$4 sm:$0xff]   ;;  %v5128_v14 = vld [vmem:[#allocation2 + $0x208] ss:$16 sps:$4 sm:$0xff]  }
  0x64   :  { %v5133_v15 = vld [vmem:[#allocation2 + $0x224] ss:$16 sps:$4 sm:$0xff]   ;;  %v5136_v16 = vld [vmem:[#allocation2 + $0x22c] ss:$16 sps:$4 sm:$0xff]   ;;  %v5131_v18 = vld [vmem:[#allocation2 + $0x220] ss:$16 sps:$4 sm:$0xff]  }
  0x65   :  { %3321 = vmatprep.mubr.bf16.mxu0 %v631_v60  ;;  %3649 = vmatprep.mubr.bf16.mxu1 %v631_v60  ;;  %v641_v17 = vcombine.high %v631_v60, %v631_v60  ;;  %v5134_v19 = vld [vmem:[#allocation2 + $0x228] ss:$16 sps:$4 sm:$0xff]   ;;  %v5139_v20 = vld [vmem:[#allocation2 + $0x244] ss:$16 sps:$4 sm:$0xff]   ;;  %v5142_v21 = vld [vmem:[#allocation2 + $0x24c] ss:$16 sps:$4 sm:$0xff]  }
  0x66   :  { %3302 = vmatpush1.bf16.msra.mxu0 %v5069_v26  ;;  %3630 = vmatpush1.bf16.msra.mxu1 %v5070_v27  ;;  %v5137_v22 = vld [vmem:[#allocation2 + $0x240] ss:$16 sps:$4 sm:$0xff]   ;;  %v5140_v23 = vld [vmem:[#allocation2 + $0x248] ss:$16 sps:$4 sm:$0xff]   ;;  %v5145_v24 = vld [vmem:[#allocation2 + $0x264] ss:$16 sps:$4 sm:$0xff]  }
  0x67   :  { %3303 = vmatprep.subr.bf16.mxu0 %v5071_v28  ;;  %3631 = vmatprep.subr.bf16.mxu1 %v5073_v29  ;;  %v5148_v25 = vld [vmem:[#allocation2 + $0x26c] ss:$16 sps:$4 sm:$0xff]   ;;  %v5143_v26 = vld [vmem:[#allocation2 + $0x260] ss:$16 sps:$4 sm:$0xff]   ;;  %v5146_v27 = vld [vmem:[#allocation2 + $0x268] ss:$16 sps:$4 sm:$0xff]  }
  0x68   :  { %v5151_v28 = vld [vmem:[#allocation2 + $0x284] ss:$16 sps:$4 sm:$0xff]   ;;  %v5154_v29 = vld [vmem:[#allocation2 + $0x28c] ss:$16 sps:$4 sm:$0xff]   ;;  %v5161_v38 = vld [vmem:[#allocation2 + $0x2c0] ss:$16 sps:$4 sm:$0xff]  }
  0x69   :  { %v5163_v36 = vld [vmem:[#allocation2 + $0x2c4] ss:$16 sps:$4 sm:$0xff]   ;;  %v5166_v37 = vld [vmem:[#allocation2 + $0x2cc] ss:$16 sps:$4 sm:$0xff]   ;;  %v5167_v42 = vld [vmem:[#allocation2 + $0x2e0] ss:$16 sps:$4 sm:$0xff]  }
  0x6a   :  { %3304 = vmatpush1.bf16.msra.mxu0 %v5075_v30  ;;  %3632 = vmatpush1.bf16.msra.mxu1 %v5076_v31  ;;  %v5149_v30 = vld [vmem:[#allocation2 + $0x280] ss:$16 sps:$4 sm:$0xff]   ;;  %v5152_v31 = vld [vmem:[#allocation2 + $0x288] ss:$16 sps:$4 sm:$0xff]   ;;  %v5196_v60 = vld [vmem:[#allocation2 + $0x36c] ss:$16 sps:$4 sm:$0xff]  }
  0x6b   :  { %3305 = vmatprep.subr.bf16.mxu0 %v5077_v32  ;;  %3633 = vmatprep.subr.bf16.mxu1 %v5079_v33  ;;  %v5157_v32 = vld [vmem:[#allocation2 + $0x2a4] ss:$16 sps:$4 sm:$0xff]   ;;  %v5160_v33 = vld [vmem:[#allocation2 + $0x2ac] ss:$16 sps:$4 sm:$0xff]   ;;  %v5182_v54 = vld [vmem:[#allocation2 + $0x328] ss:$16 sps:$4 sm:$0xff]  }
  0x6c   :  { %v5188_v58 = vld [vmem:[#allocation2 + $0x348] ss:$16 sps:$4 sm:$0xff]   ;;  %s5984_s1 = smov [#allocation11]   ;;  %vm4333_vm1 = vcmask 0  }
  0x6d   :  { %s4351_s27 = sshll.u32 %s5984_s1, 4  ;;  %s4352_s27 = int_to_ptr.vmem [resolvable:$true] %s4351_s27 }
  0x6e   :  { %3306 = vmatpush1.bf16.msra.mxu0 %v5081_v34  ;;  %3634 = vmatpush1.bf16.msra.mxu1 %v5082_v35  ;;  %v5155_v34 = vld [vmem:[#allocation2 + $0x2a0] ss:$16 sps:$4 sm:$0xff]   ;;  %v5158_v35 = vld [vmem:[#allocation2 + $0x2a8] ss:$16 sps:$4 sm:$0xff]   ;;  %s5921_s16 = scalar_lea.vmem %s4352_s27, 16  ;;  %s5925_s17 = scalar_lea.vmem %s4352_s27, 32 }
  0x6f   :  { %3307 = vmatprep.subr.bf16.mxu0 %v5083_v39  ;;  %3635 = vmatprep.subr.bf16.mxu1 %v5085_v40  ;;  %v5164_v39 = vld [vmem:[#allocation2 + $0x2c8] ss:$16 sps:$4 sm:$0xff]   ;;  %v5169_v40 = vld [vmem:[#allocation2 + $0x2e4] ss:$16 sps:$4 sm:$0xff]   ;;  %p5922_p4 = scmp.ne.s32.totalorder %s4352_s27, %s5921_s16  ;;  %p5926_p5 = scmp.lt.s32.totalorder %s4352_s27, %s4352_s27 }
  0x70   :  { %p5927_p6 = scmp.lt.s32.totalorder %s5925_s17, %s5921_s16 }
  0x72   :  { %3308 = vmatpush1.bf16.msra.mxu0 %v5087_v41  ;;  %3636 = vmatpush1.bf16.msra.mxu1 %v5088_v44  ;;  %v5172_v41 = vld [vmem:[#allocation2 + $0x2ec] ss:$16 sps:$4 sm:$0xff]   ;;  %v5170_v44 = vld [vmem:[#allocation2 + $0x2e8] ss:$16 sps:$4 sm:$0xff]   ;;  %p5928_p7 = por %p5927_p6, %p5926_p5 }
  0x73   :  { %3309 = vmatprep.subr.bf16.mxu0 %v5089_v45  ;;  %3637 = vmatprep.subr.bf16.mxu1 %v5091_v46  ;;  %v5175_v45 = vld [vmem:[#allocation2 + $0x304] ss:$16 sps:$4 sm:$0xff]   ;;  %v5178_v46 = vld [vmem:[#allocation2 + $0x30c] ss:$16 sps:$4 sm:$0xff]  }
  0x74   :  { %p5929_p8 = pnand %p5928_p7, %p5922_p4 }
  0x76   :  { %3310 = vmatpush1.bf16.msra.mxu0 %v5093_v47  ;;  %3638 = vmatpush1.bf16.msra.mxu1 %v5094_v48  ;;  %v5173_v47 = vld [vmem:[#allocation2 + $0x300] ss:$16 sps:$4 sm:$0xff]   ;;  %v5176_v48 = vld [vmem:[#allocation2 + $0x308] ss:$16 sps:$4 sm:$0xff]  }
  0x77   :  { %3311 = vmatprep.subr.bf16.mxu0 %v5095_v50  ;;  %3639 = vmatprep.subr.bf16.mxu1 %v5097_v51  ;;  %v5181_v50 = vld [vmem:[#allocation2 + $0x324] ss:$16 sps:$4 sm:$0xff]   ;;  %v5184_v51 = vld [vmem:[#allocation2 + $0x32c] ss:$16 sps:$4 sm:$0xff]  }
  0x7a   :  { %3312 = vmatpush1.bf16.msra.mxu0 %v5099_v53  ;;  %3640 = vmatpush1.bf16.msra.mxu1 %v5100_v55  ;;  %v5179_v53 = vld [vmem:[#allocation2 + $0x320] ss:$16 sps:$4 sm:$0xff]   ;;  %v5187_v55 = vld [vmem:[#allocation2 + $0x344] ss:$16 sps:$4 sm:$0xff]  }
  0x7b   :  { %3313 = vmatprep.subr.bf16.mxu0 %v5101_v56  ;;  %3641 = vmatprep.subr.bf16.mxu1 %v5103_v57  ;;  %v5190_v56 = vld [vmem:[#allocation2 + $0x34c] ss:$16 sps:$4 sm:$0xff]   ;;  %v5185_v57 = vld [vmem:[#allocation2 + $0x340] ss:$16 sps:$4 sm:$0xff]  }
  0x7e   :  { %3314 = vmatpush1.bf16.msra.mxu0 %v5105_v59  ;;  %3642 = vmatpush1.bf16.msra.mxu1 %v5106_v61  ;;  %v5193_v59 = vld [vmem:[#allocation2 + $0x364] ss:$16 sps:$4 sm:$0xff]   ;;  %v5191_v61 = vld [vmem:[#allocation2 + $0x360] ss:$16 sps:$4 sm:$0xff]  }
  0x7f   :  { %3315 = vmatprep.subr.bf16.mxu0 %v5107_v62  ;;  %3643 = vmatprep.subr.bf16.mxu1 %v5109_v63  ;;  %v5194_v62 = vld [vmem:[#allocation2 + $0x368] ss:$16 sps:$4 sm:$0xff]   ;;  %v5199_v63 = vld [vmem:[#allocation2 + $0x384] ss:$16 sps:$4 sm:$0xff]  }
  0x82   :  { %3316 = vmatpush1.bf16.msra.mxu0 %v5111_v0  ;;  %3644 = vmatpush1.bf16.msra.mxu1 %v5112_v1  ;;  %v5202_v0 = vld [vmem:[#allocation2 + $0x38c] ss:$16 sps:$4 sm:$0xff]   ;;  %v5197_v1 = vld [vmem:[#allocation2 + $0x380] ss:$16 sps:$4 sm:$0xff]  }
  0x83   :  { %3317 = vmatprep.subr.bf16.mxu0 %v5113_v2  ;;  %3645 = vmatprep.subr.bf16.mxu1 %v5115_v3  ;;  %v5200_v2 = vld [vmem:[#allocation2 + $0x388] ss:$16 sps:$4 sm:$0xff]   ;;  %v5205_v3 = vld [vmem:[#allocation2 + $0x3a4] ss:$16 sps:$4 sm:$0xff]  }
  0x86   :  { %3318 = vmatpush1.bf16.msra.mxu0 %v5117_v4  ;;  %3646 = vmatpush1.bf16.msra.mxu1 %v5118_v5  ;;  %v5208_v4 = vld [vmem:[#allocation2 + $0x3ac] ss:$16 sps:$4 sm:$0xff]   ;;  %v5203_v5 = vld [vmem:[#allocation2 + $0x3a0] ss:$16 sps:$4 sm:$0xff]  }
  0x87   :  { %3319 = vmatprep.subr.bf16.mxu0 %v5119_v6  ;;  %3647 = vmatprep.subr.bf16.mxu1 %v5121_v7  ;;  %v5206_v6 = vld [vmem:[#allocation2 + $0x3a8] ss:$16 sps:$4 sm:$0xff]   ;;  %v5211_v7 = vld [vmem:[#allocation2 + $0x3c4] ss:$16 sps:$4 sm:$0xff]  }
  0x8a   :  { %3320 = vmatpush1.bf16.msra.mxu0 %v5123_v8  ;;  %3648 = vmatpush1.bf16.msra.mxu1 %v5124_v9  ;;  %v5214_v8 = vld [vmem:[#allocation2 + $0x3cc] ss:$16 sps:$4 sm:$0xff]   ;;  %v594_v9 = vcombine.high %v6089_v52, %v6089_v52 }
  0x8b   :  { %3330 = vmatprep.subr.bf16.mxu0 %v5127_v10  ;;  %3658 = vmatprep.subr.bf16.mxu1 %v5130_v11  ;;  %v5209_v10 = vld [vmem:[#allocation2 + $0x3c0] ss:$16 sps:$4 sm:$0xff]   ;;  %v5212_v11 = vld [vmem:[#allocation2 + $0x3c8] ss:$16 sps:$4 sm:$0xff]  }
  0x8d   :  { %3322 = vmatmul.mubr.bf16.vlgmr.msra.gmra.mrb[0].mxu0 %v6095_v13  ;;  %3650 = vmatmul.mubr.bf16.vlgmr.msra.gmra.mrb[0].mxu1 %v6095_v13 }
  0x8e   :  { %3331 = vmatpush1.bf16.msra.mxu0 %v5125_v12  ;;  %3659 = vmatpush1.bf16.msra.mxu1 %v5128_v14  ;;  %v5217_v12 = vld [vmem:[#allocation2 + $0x3e4] ss:$16 sps:$4 sm:$0xff]   ;;  %v5220_v14 = vld [vmem:[#allocation2 + $0x3ec] ss:$16 sps:$4 sm:$0xff]  }
  0x8f   :  { %3332 = vmatprep.subr.bf16.mxu0 %v5133_v15  ;;  %3660 = vmatprep.subr.bf16.mxu1 %v5136_v16  ;;  %v6102_v15 = vrot.slane %v594_v9, %v6084_v49  ;;  %v5215_v16 = vld [vmem:[#allocation2 + $0x3e0] ss:$16 sps:$4 sm:$0xff]   ;;  %v5296_v9 = vld [vmem:[#allocation2 + $0x588] ss:$16 sps:$4 sm:$0xff]  }
  0x90   :  { %3362 = vmatprep.mubr.bf16.mxu0 %v641_v17  ;;  %3690 = vmatprep.mubr.bf16.mxu1 %v641_v17  ;;  %v5218_v17 = vld [vmem:[#allocation2 + $0x3e8] ss:$16 sps:$4 sm:$0xff]  }
  0x91   :  { %v610_v52 = vcombine.high %v6102_v15, %v6102_v15 }
  0x92   :  { %3333 = vmatpush1.bf16.msra.mxu0 %v5131_v18  ;;  %3661 = vmatpush1.bf16.msra.mxu1 %v5134_v19  ;;  %v5223_v18 = vld [vmem:[#allocation2 + $0x404] ss:$16 sps:$4 sm:$0xff]   ;;  %v5226_v19 = vld [vmem:[#allocation2 + $0x40c] ss:$16 sps:$4 sm:$0xff]  }
  0x93   :  { %3334 = vmatprep.subr.bf16.mxu0 %v5139_v20  ;;  %3662 = vmatprep.subr.bf16.mxu1 %v5142_v21  ;;  %v5221_v20 = vld [vmem:[#allocation2 + $0x400] ss:$16 sps:$4 sm:$0xff]   ;;  %v639_v21 = vcombine.high %v6095_v13, %v6095_v13  ;;  %v5238_v13 = vld [vmem:[#allocation2 + $0x44c] ss:$16 sps:$4 sm:$0xff]  }
  0x96   :  { %3335 = vmatpush1.bf16.msra.mxu0 %v5137_v22  ;;  %3663 = vmatpush1.bf16.msra.mxu1 %v5140_v23  ;;  %v5224_v22 = vld [vmem:[#allocation2 + $0x408] ss:$16 sps:$4 sm:$0xff]   ;;  %v5229_v23 = vld [vmem:[#allocation2 + $0x424] ss:$16 sps:$4 sm:$0xff]  }
  0x97   :  { %3336 = vmatprep.subr.bf16.mxu0 %v5145_v24  ;;  %3664 = vmatprep.subr.bf16.mxu1 %v5148_v25  ;;  %v5232_v24 = vld [vmem:[#allocation2 + $0x42c] ss:$16 sps:$4 sm:$0xff]   ;;  %v6109_v25 = vrot.slane %v610_v52, %v6084_v49  ;;  %v5313_v52 = vld [vmem:[#allocation2 + $0x5e4] ss:$16 sps:$4 sm:$0xff]  }
  0x9a   :  { %3337 = vmatpush1.bf16.msra.mxu0 %v5143_v26  ;;  %3665 = vmatpush1.bf16.msra.mxu1 %v5146_v27  ;;  %v5227_v26 = vld [vmem:[#allocation2 + $0x420] ss:$16 sps:$4 sm:$0xff]   ;;  %v5230_v27 = vld [vmem:[#allocation2 + $0x428] ss:$16 sps:$4 sm:$0xff]  }
  0x9b   :  { %3338 = vmatprep.subr.bf16.mxu0 %v5151_v28  ;;  %3666 = vmatprep.subr.bf16.mxu1 %v5154_v29  ;;  %v5235_v28 = vld [vmem:[#allocation2 + $0x444] ss:$16 sps:$4 sm:$0xff]   ;;  %v5233_v29 = vld [vmem:[#allocation2 + $0x440] ss:$16 sps:$4 sm:$0xff]  }
  0x9e   :  { %3339 = vmatpush1.bf16.msra.mxu0 %v5149_v30  ;;  %3667 = vmatpush1.bf16.msra.mxu1 %v5152_v31  ;;  %v5236_v30 = vld [vmem:[#allocation2 + $0x448] ss:$16 sps:$4 sm:$0xff]   ;;  %v5241_v31 = vld [vmem:[#allocation2 + $0x464] ss:$16 sps:$4 sm:$0xff]  }
  0x9f   :  { %3340 = vmatprep.subr.bf16.mxu0 %v5157_v32  ;;  %3668 = vmatprep.subr.bf16.mxu1 %v5160_v33  ;;  %v5244_v32 = vld [vmem:[#allocation2 + $0x46c] ss:$16 sps:$4 sm:$0xff]   ;;  %v5239_v33 = vld [vmem:[#allocation2 + $0x460] ss:$16 sps:$4 sm:$0xff]  }
  0xa2   :  { %3341 = vmatpush1.bf16.msra.mxu0 %v5155_v34  ;;  %3669 = vmatpush1.bf16.msra.mxu1 %v5158_v35  ;;  %v5242_v34 = vld [vmem:[#allocation2 + $0x468] ss:$16 sps:$4 sm:$0xff]   ;;  %v5247_v35 = vld [vmem:[#allocation2 + $0x484] ss:$16 sps:$4 sm:$0xff]  }
  0xa3   :  { %3342 = vmatprep.subr.bf16.mxu0 %v5163_v36  ;;  %3670 = vmatprep.subr.bf16.mxu1 %v5166_v37  ;;  %v5250_v36 = vld [vmem:[#allocation2 + $0x48c] ss:$16 sps:$4 sm:$0xff]   ;;  %v5245_v37 = vld [vmem:[#allocation2 + $0x480] ss:$16 sps:$4 sm:$0xff]  }
  0xa6   :  { %3343 = vmatpush1.bf16.msra.mxu0 %v5161_v38  ;;  %3671 = vmatpush1.bf16.msra.mxu1 %v5164_v39  ;;  %v5248_v38 = vld [vmem:[#allocation2 + $0x488] ss:$16 sps:$4 sm:$0xff]   ;;  %v5253_v39 = vld [vmem:[#allocation2 + $0x4a4] ss:$16 sps:$4 sm:$0xff]  }
  0xa7   :  { %3344 = vmatprep.subr.bf16.mxu0 %v5169_v40  ;;  %3672 = vmatprep.subr.bf16.mxu1 %v5172_v41  ;;  %v5256_v40 = vld [vmem:[#allocation2 + $0x4ac] ss:$16 sps:$4 sm:$0xff]   ;;  %v5251_v41 = vld [vmem:[#allocation2 + $0x4a0] ss:$16 sps:$4 sm:$0xff]  }
  0xaa   :  { %3345 = vmatpush1.bf16.msra.mxu0 %v5167_v42  ;;  %3673 = vmatpush1.bf16.msra.mxu1 %v5170_v44  ;;  %v5254_v42 = vld [vmem:[#allocation2 + $0x4a8] ss:$16 sps:$4 sm:$0xff]   ;;  %v5259_v44 = vld [vmem:[#allocation2 + $0x4c4] ss:$16 sps:$4 sm:$0xff]  }
  0xab   :  { %3346 = vmatprep.subr.bf16.mxu0 %v5175_v45  ;;  %3674 = vmatprep.subr.bf16.mxu1 %v5178_v46  ;;  %v5262_v45 = vld [vmem:[#allocation2 + $0x4cc] ss:$16 sps:$4 sm:$0xff]   ;;  %v5257_v46 = vld [vmem:[#allocation2 + $0x4c0] ss:$16 sps:$4 sm:$0xff]  }
  0xae   :  { %3347 = vmatpush1.bf16.msra.mxu0 %v5173_v47  ;;  %3675 = vmatpush1.bf16.msra.mxu1 %v5176_v48  ;;  %v5260_v47 = vld [vmem:[#allocation2 + $0x4c8] ss:$16 sps:$4 sm:$0xff]   ;;  %v5265_v48 = vld [vmem:[#allocation2 + $0x4e4] ss:$16 sps:$4 sm:$0xff]  }
  0xaf   :  { %3348 = vmatprep.subr.bf16.mxu0 %v5181_v50  ;;  %3676 = vmatprep.subr.bf16.mxu1 %v5184_v51  ;;  %v5268_v50 = vld [vmem:[#allocation2 + $0x4ec] ss:$16 sps:$4 sm:$0xff]   ;;  %v5263_v51 = vld [vmem:[#allocation2 + $0x4e0] ss:$16 sps:$4 sm:$0xff]  }
  0xb2   :  { %3349 = vmatpush1.bf16.msra.mxu0 %v5179_v53  ;;  %3677 = vmatpush1.bf16.msra.mxu1 %v5182_v54  ;;  %v5266_v53 = vld [vmem:[#allocation2 + $0x4e8] ss:$16 sps:$4 sm:$0xff]   ;;  %v5271_v54 = vld [vmem:[#allocation2 + $0x504] ss:$16 sps:$4 sm:$0xff]  }
  0xb3   :  { %3350 = vmatprep.subr.bf16.mxu0 %v5187_v55  ;;  %3678 = vmatprep.subr.bf16.mxu1 %v5190_v56  ;;  %v5274_v55 = vld [vmem:[#allocation2 + $0x50c] ss:$16 sps:$4 sm:$0xff]   ;;  %v5269_v56 = vld [vmem:[#allocation2 + $0x500] ss:$16 sps:$4 sm:$0xff]  }
  0xb6   :  { %3351 = vmatpush1.bf16.msra.mxu0 %v5185_v57  ;;  %3679 = vmatpush1.bf16.msra.mxu1 %v5188_v58  ;;  %v5272_v57 = vld [vmem:[#allocation2 + $0x508] ss:$16 sps:$4 sm:$0xff]   ;;  %v5277_v58 = vld [vmem:[#allocation2 + $0x524] ss:$16 sps:$4 sm:$0xff]  }
  0xb7   :  { %3352 = vmatprep.subr.bf16.mxu0 %v5193_v59  ;;  %3680 = vmatprep.subr.bf16.mxu1 %v5196_v60  ;;  %v5280_v59 = vld [vmem:[#allocation2 + $0x52c] ss:$16 sps:$4 sm:$0xff]   ;;  %v5275_v60 = vld [vmem:[#allocation2 + $0x520] ss:$16 sps:$4 sm:$0xff]  }
  0xba   :  { %3353 = vmatpush1.bf16.msra.mxu0 %v5191_v61  ;;  %3681 = vmatpush1.bf16.msra.mxu1 %v5194_v62  ;;  %v5278_v61 = vld [vmem:[#allocation2 + $0x528] ss:$16 sps:$4 sm:$0xff]   ;;  %v5283_v62 = vld [vmem:[#allocation2 + $0x544] ss:$16 sps:$4 sm:$0xff]  }
  0xbb   :  { %3354 = vmatprep.subr.bf16.mxu0 %v5199_v63  ;;  %3682 = vmatprep.subr.bf16.mxu1 %v5202_v0  ;;  %v5286_v63 = vld [vmem:[#allocation2 + $0x54c] ss:$16 sps:$4 sm:$0xff]   ;;  %v5281_v0 = vld [vmem:[#allocation2 + $0x540] ss:$16 sps:$4 sm:$0xff]  }
  0xbe   :  { %3355 = vmatpush1.bf16.msra.mxu0 %v5197_v1  ;;  %3683 = vmatpush1.bf16.msra.mxu1 %v5200_v2  ;;  %v5284_v1 = vld [vmem:[#allocation2 + $0x548] ss:$16 sps:$4 sm:$0xff]   ;;  %v5289_v2 = vld [vmem:[#allocation2 + $0x564] ss:$16 sps:$4 sm:$0xff]  }
  0xbf   :  { %3356 = vmatprep.subr.bf16.mxu0 %v5205_v3  ;;  %3684 = vmatprep.subr.bf16.mxu1 %v5208_v4  ;;  %v5292_v3 = vld [vmem:[#allocation2 + $0x56c] ss:$16 sps:$4 sm:$0xff]   ;;  %v5287_v4 = vld [vmem:[#allocation2 + $0x560] ss:$16 sps:$4 sm:$0xff]  }
  0xc2   :  { %3357 = vmatpush1.bf16.msra.mxu0 %v5203_v5  ;;  %3685 = vmatpush1.bf16.msra.mxu1 %v5206_v6  ;;  %v5290_v5 = vld [vmem:[#allocation2 + $0x568] ss:$16 sps:$4 sm:$0xff]   ;;  %v5295_v6 = vld [vmem:[#allocation2 + $0x584] ss:$16 sps:$4 sm:$0xff]  }
  0xc3   :  { %3358 = vmatprep.subr.bf16.mxu0 %v5211_v7  ;;  %3686 = vmatprep.subr.bf16.mxu1 %v5214_v8  ;;  %v5298_v7 = vld [vmem:[#allocation2 + $0x58c] ss:$16 sps:$4 sm:$0xff]   ;;  %v5293_v8 = vld [vmem:[#allocation2 + $0x580] ss:$16 sps:$4 sm:$0xff]  }
  0xc6   :  { %3359 = vmatpush1.bf16.msra.mxu0 %v5209_v10  ;;  %3687 = vmatpush1.bf16.msra.mxu1 %v5212_v11  ;;  %v5301_v10 = vld [vmem:[#allocation2 + $0x5a4] ss:$16 sps:$4 sm:$0xff]   ;;  %v5304_v11 = vld [vmem:[#allocation2 + $0x5ac] ss:$16 sps:$4 sm:$0xff]  }
  0xc7   :  { %3360 = vmatprep.subr.bf16.mxu0 %v5217_v12  ;;  %3688 = vmatprep.subr.bf16.mxu1 %v5220_v14  ;;  %v5299_v12 = vld [vmem:[#allocation2 + $0x5a0] ss:$16 sps:$4 sm:$0xff]   ;;  %v5302_v14 = vld [vmem:[#allocation2 + $0x5a8] ss:$16 sps:$4 sm:$0xff]  }
  0xca   :  { %3361 = vmatpush1.bf16.msra.mxu0 %v5215_v16  ;;  %3689 = vmatpush1.bf16.msra.mxu1 %v5218_v17  ;;  %v5307_v16 = vld [vmem:[#allocation2 + $0x5c4] ss:$16 sps:$4 sm:$0xff]   ;;  %v5310_v17 = vld [vmem:[#allocation2 + $0x5cc] ss:$16 sps:$4 sm:$0xff]  }
  0xcb   :  { %3371 = vmatprep.subr.bf16.mxu0 %v5223_v18  ;;  %3699 = vmatprep.subr.bf16.mxu1 %v5226_v19  ;;  %v5305_v18 = vld [vmem:[#allocation2 + $0x5c0] ss:$16 sps:$4 sm:$0xff]   ;;  %v5308_v19 = vld [vmem:[#allocation2 + $0x5c8] ss:$16 sps:$4 sm:$0xff]  }
  0xcd   :  { %3363 = vmatmul.mubr.bf16.vlgmr.msra.gmra.mrb[0].mxu0 %v639_v21  ;;  %3691 = vmatmul.mubr.bf16.vlgmr.msra.gmra.mrb[0].mxu1 %v639_v21  ;;  %v5311_v21 = vld [vmem:[#allocation2 + $0x5e0] ss:$16 sps:$4 sm:$0xff]  }
  0xce   :  { %3372 = vmatpush1.bf16.msra.mxu0 %v5221_v20  ;;  %3700 = vmatpush1.bf16.msra.mxu1 %v5224_v22  ;;  %v5316_v20 = vld [vmem:[#allocation2 + $0x5ec] ss:$16 sps:$4 sm:$0xff]   ;;  %v5314_v22 = vld [vmem:[#allocation2 + $0x5e8] ss:$16 sps:$4 sm:$0xff]  }
  0xcf   :  { %3373 = vmatprep.subr.bf16.mxu0 %v5229_v23  ;;  %3701 = vmatprep.subr.bf16.mxu1 %v5232_v24  ;;  %v5320_v23 = vld [vmem:[#allocation2 + $0x604] ss:$16 sps:$4 sm:$0xff]   ;;  %v5323_v24 = vld [vmem:[#allocation2 + $0x60c] ss:$16 sps:$4 sm:$0xff]  }
  0xd0   :  { %3403 = vmatprep.mubr.bf16.mxu0 %v6109_v25  ;;  %3731 = vmatprep.mubr.bf16.mxu1 %v6109_v25 }
  0xd2   :  { %3374 = vmatpush1.bf16.msra.mxu0 %v5227_v26  ;;  %3702 = vmatpush1.bf16.msra.mxu1 %v5230_v27  ;;  %v5318_v26 = vld [vmem:[#allocation2 + $0x600] ss:$16 sps:$4 sm:$0xff]   ;;  %v6115_v27 = vrot.slane %v6102_v15, %v6084_v49  ;;  %v5332_v15 = vld [vmem:[#allocation2 + $0x644] ss:$16 sps:$4 sm:$0xff]  }
  0xd3   :  { %3375 = vmatprep.subr.bf16.mxu0 %v5235_v28  ;;  %3703 = vmatprep.subr.bf16.mxu1 %v5238_v13  ;;  %v5321_v28 = vld [vmem:[#allocation2 + $0x608] ss:$16 sps:$4 sm:$0xff]   ;;  %v5326_v13 = vld [vmem:[#allocation2 + $0x624] ss:$16 sps:$4 sm:$0xff]  }
  0xd6   :  { %3376 = vmatpush1.bf16.msra.mxu0 %v5233_v29  ;;  %3704 = vmatpush1.bf16.msra.mxu1 %v5236_v30  ;;  %v5329_v29 = vld [vmem:[#allocation2 + $0x62c] ss:$16 sps:$4 sm:$0xff]   ;;  %v642_v30 = vcombine.high %v6109_v25, %v6109_v25  ;;  %v5338_v25 = vld [vmem:[#allocation2 + $0x664] ss:$16 sps:$4 sm:$0xff]  }
  0xd7   :  { %3377 = vmatprep.subr.bf16.mxu0 %v5241_v31  ;;  %3705 = vmatprep.subr.bf16.mxu1 %v5244_v32  ;;  %v5324_v31 = vld [vmem:[#allocation2 + $0x620] ss:$16 sps:$4 sm:$0xff]   ;;  %v5327_v32 = vld [vmem:[#allocation2 + $0x628] ss:$16 sps:$4 sm:$0xff]  }
  0xda   :  { %3378 = vmatpush1.bf16.msra.mxu0 %v5239_v33  ;;  %3706 = vmatpush1.bf16.msra.mxu1 %v5242_v34  ;;  %v5335_v33 = vld [vmem:[#allocation2 + $0x64c] ss:$16 sps:$4 sm:$0xff]   ;;  %v5330_v34 = vld [vmem:[#allocation2 + $0x640] ss:$16 sps:$4 sm:$0xff]  }
  0xdb   :  { %3379 = vmatprep.subr.bf16.mxu0 %v5247_v35  ;;  %3707 = vmatprep.subr.bf16.mxu1 %v5250_v36  ;;  %v5333_v35 = vld [vmem:[#allocation2 + $0x648] ss:$16 sps:$4 sm:$0xff]   ;;  %v5341_v36 = vld [vmem:[#allocation2 + $0x66c] ss:$16 sps:$4 sm:$0xff]  }
  0xde   :  { %3380 = vmatpush1.bf16.msra.mxu0 %v5245_v37  ;;  %3708 = vmatpush1.bf16.msra.mxu1 %v5248_v38  ;;  %v5336_v37 = vld [vmem:[#allocation2 + $0x660] ss:$16 sps:$4 sm:$0xff]   ;;  %v5339_v38 = vld [vmem:[#allocation2 + $0x668] ss:$16 sps:$4 sm:$0xff]  }
  0xdf   :  { %3381 = vmatprep.subr.bf16.mxu0 %v5253_v39  ;;  %3709 = vmatprep.subr.bf16.mxu1 %v5256_v40  ;;  %v5344_v39 = vld [vmem:[#allocation2 + $0x684] ss:$16 sps:$4 sm:$0xff]   ;;  %v5347_v40 = vld [vmem:[#allocation2 + $0x68c] ss:$16 sps:$4 sm:$0xff]  }
  0xe2   :  { %3382 = vmatpush1.bf16.msra.mxu0 %v5251_v41  ;;  %3710 = vmatpush1.bf16.msra.mxu1 %v5254_v42  ;;  %v5342_v41 = vld [vmem:[#allocation2 + $0x680] ss:$16 sps:$4 sm:$0xff]   ;;  %v5345_v42 = vld [vmem:[#allocation2 + $0x688] ss:$16 sps:$4 sm:$0xff]  }
  0xe3   :  { %3383 = vmatprep.subr.bf16.mxu0 %v5259_v44  ;;  %3711 = vmatprep.subr.bf16.mxu1 %v5262_v45  ;;  %v5350_v44 = vld [vmem:[#allocation2 + $0x6a4] ss:$16 sps:$4 sm:$0xff]   ;;  %v5353_v45 = vld [vmem:[#allocation2 + $0x6ac] ss:$16 sps:$4 sm:$0xff]  }
  0xe6   :  { %3384 = vmatpush1.bf16.msra.mxu0 %v5257_v46  ;;  %3712 = vmatpush1.bf16.msra.mxu1 %v5260_v47  ;;  %v5348_v46 = vld [vmem:[#allocation2 + $0x6a0] ss:$16 sps:$4 sm:$0xff]   ;;  %v5351_v47 = vld [vmem:[#allocation2 + $0x6a8] ss:$16 sps:$4 sm:$0xff]  }
  0xe7   :  { %3385 = vmatprep.subr.bf16.mxu0 %v5265_v48  ;;  %3713 = vmatprep.subr.bf16.mxu1 %v5268_v50  ;;  %v5356_v48 = vld [vmem:[#allocation2 + $0x6c4] ss:$16 sps:$4 sm:$0xff]   ;;  %v5359_v50 = vld [vmem:[#allocation2 + $0x6cc] ss:$16 sps:$4 sm:$0xff]  }
  0xea   :  { %3386 = vmatpush1.bf16.msra.mxu0 %v5263_v51  ;;  %3714 = vmatpush1.bf16.msra.mxu1 %v5266_v53  ;;  %v5354_v51 = vld [vmem:[#allocation2 + $0x6c0] ss:$16 sps:$4 sm:$0xff]   ;;  %v5357_v53 = vld [vmem:[#allocation2 + $0x6c8] ss:$16 sps:$4 sm:$0xff]  }
  0xeb   :  { %3387 = vmatprep.subr.bf16.mxu0 %v5271_v54  ;;  %3715 = vmatprep.subr.bf16.mxu1 %v5274_v55  ;;  %v5362_v54 = vld [vmem:[#allocation2 + $0x6e4] ss:$16 sps:$4 sm:$0xff]   ;;  %v5365_v55 = vld [vmem:[#allocation2 + $0x6ec] ss:$16 sps:$4 sm:$0xff]  }
  0xee   :  { %3388 = vmatpush1.bf16.msra.mxu0 %v5269_v56  ;;  %3716 = vmatpush1.bf16.msra.mxu1 %v5272_v57  ;;  %v5360_v56 = vld [vmem:[#allocation2 + $0x6e0] ss:$16 sps:$4 sm:$0xff]   ;;  %v5363_v57 = vld [vmem:[#allocation2 + $0x6e8] ss:$16 sps:$4 sm:$0xff]  }
  0xef   :  { %3389 = vmatprep.subr.bf16.mxu0 %v5277_v58  ;;  %3717 = vmatprep.subr.bf16.mxu1 %v5280_v59  ;;  %v5368_v58 = vld [vmem:[#allocation2 + $0x704] ss:$16 sps:$4 sm:$0xff]   ;;  %v5371_v59 = vld [vmem:[#allocation2 + $0x70c] ss:$16 sps:$4 sm:$0xff]  }
  0xf2   :  { %3390 = vmatpush1.bf16.msra.mxu0 %v5275_v60  ;;  %3718 = vmatpush1.bf16.msra.mxu1 %v5278_v61  ;;  %v5366_v60 = vld [vmem:[#allocation2 + $0x700] ss:$16 sps:$4 sm:$0xff]   ;;  %v5369_v61 = vld [vmem:[#allocation2 + $0x708] ss:$16 sps:$4 sm:$0xff]  }
  0xf3   :  { %3391 = vmatprep.subr.bf16.mxu0 %v5283_v62  ;;  %3719 = vmatprep.subr.bf16.mxu1 %v5286_v63  ;;  %v5374_v62 = vld [vmem:[#allocation2 + $0x724] ss:$16 sps:$4 sm:$0xff]   ;;  %v5377_v63 = vld [vmem:[#allocation2 + $0x72c] ss:$16 sps:$4 sm:$0xff]  }
  0xf6   :  { %3392 = vmatpush1.bf16.msra.mxu0 %v5281_v0  ;;  %3720 = vmatpush1.bf16.msra.mxu1 %v5284_v1  ;;  %v5372_v0 = vld [vmem:[#allocation2 + $0x720] ss:$16 sps:$4 sm:$0xff]   ;;  %v5375_v1 = vld [vmem:[#allocation2 + $0x728] ss:$16 sps:$4 sm:$0xff]  }
  0xf7   :  { %3393 = vmatprep.subr.bf16.mxu0 %v5289_v2  ;;  %3721 = vmatprep.subr.bf16.mxu1 %v5292_v3  ;;  %v5380_v2 = vld [vmem:[#allocation2 + $0x744] ss:$16 sps:$4 sm:$0xff]   ;;  %v5383_v3 = vld [vmem:[#allocation2 + $0x74c] ss:$16 sps:$4 sm:$0xff]  }
  0xfa   :  { %3394 = vmatpush1.bf16.msra.mxu0 %v5287_v4  ;;  %3722 = vmatpush1.bf16.msra.mxu1 %v5290_v5  ;;  %v5378_v4 = vld [vmem:[#allocation2 + $0x740] ss:$16 sps:$4 sm:$0xff]   ;;  %v5381_v5 = vld [vmem:[#allocation2 + $0x748] ss:$16 sps:$4 sm:$0xff]  }
  0xfb   :  { %3395 = vmatprep.subr.bf16.mxu0 %v5295_v6  ;;  %3723 = vmatprep.subr.bf16.mxu1 %v5298_v7  ;;  %v5386_v6 = vld [vmem:[#allocation2 + $0x764] ss:$16 sps:$4 sm:$0xff]   ;;  %v5389_v7 = vld [vmem:[#allocation2 + $0x76c] ss:$16 sps:$4 sm:$0xff]  }
  0xfe   :  { %3396 = vmatpush1.bf16.msra.mxu0 %v5293_v8  ;;  %3724 = vmatpush1.bf16.msra.mxu1 %v5296_v9  ;;  %v5384_v8 = vld [vmem:[#allocation2 + $0x760] ss:$16 sps:$4 sm:$0xff]   ;;  %v5387_v9 = vld [vmem:[#allocation2 + $0x768] ss:$16 sps:$4 sm:$0xff]  }
  0xff   :  { %3397 = vmatprep.subr.bf16.mxu0 %v5301_v10  ;;  %3725 = vmatprep.subr.bf16.mxu1 %v5304_v11  ;;  %v5392_v10 = vld [vmem:[#allocation2 + $0x784] ss:$16 sps:$4 sm:$0xff]   ;;  %v5395_v11 = vld [vmem:[#allocation2 + $0x78c] ss:$16 sps:$4 sm:$0xff]  }
 0x102   :  { %3398 = vmatpush1.bf16.msra.mxu0 %v5299_v12  ;;  %3726 = vmatpush1.bf16.msra.mxu1 %v5302_v14  ;;  %v5390_v12 = vld [vmem:[#allocation2 + $0x780] ss:$16 sps:$4 sm:$0xff]   ;;  %v5393_v14 = vld [vmem:[#allocation2 + $0x788] ss:$16 sps:$4 sm:$0xff]  }
 0x103   :  { %3399 = vmatprep.subr.bf16.mxu0 %v5307_v16  ;;  %3727 = vmatprep.subr.bf16.mxu1 %v5310_v17  ;;  %v5398_v16 = vld [vmem:[#allocation2 + $0x7a4] ss:$16 sps:$4 sm:$0xff]   ;;  %v5401_v17 = vld [vmem:[#allocation2 + $0x7ac] ss:$16 sps:$4 sm:$0xff]  }
 0x106   :  { %3400 = vmatpush1.bf16.msra.mxu0 %v5305_v18  ;;  %3728 = vmatpush1.bf16.msra.mxu1 %v5308_v19  ;;  %v5396_v18 = vld [vmem:[#allocation2 + $0x7a0] ss:$16 sps:$4 sm:$0xff]   ;;  %v5399_v19 = vld [vmem:[#allocation2 + $0x7a8] ss:$16 sps:$4 sm:$0xff]  }
 0x107   :  { %3401 = vmatprep.subr.bf16.mxu0 %v5313_v52  ;;  %3729 = vmatprep.subr.bf16.mxu1 %v5316_v20  ;;  %v5404_v52 = vld [vmem:[#allocation2 + $0x7c4] ss:$16 sps:$4 sm:$0xff]   ;;  %v5407_v20 = vld [vmem:[#allocation2 + $0x7cc] ss:$16 sps:$4 sm:$0xff]  }
 0x10a   :  { %3402 = vmatpush1.bf16.msra.mxu0 %v5311_v21  ;;  %3730 = vmatpush1.bf16.msra.mxu1 %v5314_v22  ;;  %v6124_v21 = vld [vmem:[%s6297_s0 + $0x8] sm:$0xff]  ;;  %v5402_v22 = vld [vmem:[#allocation2 + $0x7c0] ss:$16 sps:$4 sm:$0xff]  }
 0x10b   :  { %3412 = vmatprep.subr.bf16.mxu0 %v5320_v23  ;;  %3740 = vmatprep.subr.bf16.mxu1 %v5323_v24  ;;  %v5405_v23 = vld [vmem:[#allocation2 + $0x7c8] ss:$16 sps:$4 sm:$0xff]   ;;  %v5410_v24 = vld [vmem:[#allocation2 + $0x7e4] ss:$16 sps:$4 sm:$0xff]  }
 0x10d   :  { %3404 = vmatmul.mubr.bf16.vlgmr.msra.gmra.mrb[0].mxu0 %v6115_v27  ;;  %3732 = vmatmul.mubr.bf16.vlgmr.msra.gmra.mrb[0].mxu1 %v6115_v27 }
 0x10e   :  { %3413 = vmatpush1.bf16.msra.mxu0 %v5318_v26  ;;  %3741 = vmatpush1.bf16.msra.mxu1 %v5321_v28  ;;  %v5413_v26 = vld [vmem:[#allocation2 + $0x7ec] ss:$16 sps:$4 sm:$0xff]   ;;  %v6128_v28 = vrot.slane %v6124_v21, %v6084_v49 }
 0x10f   :  { %3414 = vmatprep.subr.bf16.mxu0 %v5326_v13  ;;  %3742 = vmatprep.subr.bf16.mxu1 %v5329_v29  ;;  %v5408_v13 = vld [vmem:[#allocation2 + $0x7e0] ss:$16 sps:$4 sm:$0xff]   ;;  %v5411_v29 = vld [vmem:[#allocation2 + $0x7e8] ss:$16 sps:$4 sm:$0xff]  }
 0x110   :  { %3444 = vmatprep.mubr.bf16.mxu0 %v642_v30  ;;  %3772 = vmatprep.mubr.bf16.mxu1 %v642_v30  ;;  %v5416_v30 = vld [vmem:[#allocation2 + $0x804] ss:$16 sps:$4 sm:$0xff]  }
 0x112   :  { %3415 = vmatpush1.bf16.msra.mxu0 %v5324_v31  ;;  %3743 = vmatpush1.bf16.msra.mxu1 %v5327_v32  ;;  %v5419_v31 = vld [vmem:[#allocation2 + $0x80c] ss:$16 sps:$4 sm:$0xff]   ;;  %v658_v32 = vcombine.high %v6128_v28, %v6128_v28 }
 0x113   :  { %3416 = vmatprep.subr.bf16.mxu0 %v5332_v15  ;;  %3744 = vmatprep.subr.bf16.mxu1 %v5335_v33  ;;  %v640_v15 = vcombine.high %v6115_v27, %v6115_v27  ;;  %v5414_v33 = vld [vmem:[#allocation2 + $0x800] ss:$16 sps:$4 sm:$0xff]   ;;  %v5428_v27 = vld [vmem:[#allocation2 + $0x844] ss:$16 sps:$4 sm:$0xff]  }
 0x116   :  { %3417 = vmatpush1.bf16.msra.mxu0 %v5330_v34  ;;  %3745 = vmatpush1.bf16.msra.mxu1 %v5333_v35  ;;  %v5417_v34 = vld [vmem:[#allocation2 + $0x808] ss:$16 sps:$4 sm:$0xff]   ;;  %v5422_v35 = vld [vmem:[#allocation2 + $0x824] ss:$16 sps:$4 sm:$0xff]  }
 0x117   :  { %3418 = vmatprep.subr.bf16.mxu0 %v5338_v25  ;;  %3746 = vmatprep.subr.bf16.mxu1 %v5341_v36  ;;  %v5425_v25 = vld [vmem:[#allocation2 + $0x82c] ss:$16 sps:$4 sm:$0xff]   ;;  %v6135_v36 = vrot.slane %v658_v32, %v6084_v49  ;;  %v5501_v32 = vld [vmem:[#allocation2 + $0x9c8] ss:$16 sps:$4 sm:$0xff]  }
 0x11a   :  { %3419 = vmatpush1.bf16.msra.mxu0 %v5336_v37  ;;  %3747 = vmatpush1.bf16.msra.mxu1 %v5339_v38  ;;  %v5420_v37 = vld [vmem:[#allocation2 + $0x820] ss:$16 sps:$4 sm:$0xff]   ;;  %v5423_v38 = vld [vmem:[#allocation2 + $0x828] ss:$16 sps:$4 sm:$0xff]  }
 0x11b   :  { %3420 = vmatprep.subr.bf16.mxu0 %v5344_v39  ;;  %3748 = vmatprep.subr.bf16.mxu1 %v5347_v40  ;;  %v5431_v39 = vld [vmem:[#allocation2 + $0x84c] ss:$16 sps:$4 sm:$0xff]   ;;  %v5426_v40 = vld [vmem:[#allocation2 + $0x840] ss:$16 sps:$4 sm:$0xff]  }
 0x11e   :  { %3421 = vmatpush1.bf16.msra.mxu0 %v5342_v41  ;;  %3749 = vmatpush1.bf16.msra.mxu1 %v5345_v42  ;;  %v5429_v41 = vld [vmem:[#allocation2 + $0x848] ss:$16 sps:$4 sm:$0xff]   ;;  %v5434_v42 = vld [vmem:[#allocation2 + $0x864] ss:$16 sps:$4 sm:$0xff]  }
 0x11f   :  { %3422 = vmatprep.subr.bf16.mxu0 %v5350_v44  ;;  %3750 = vmatprep.subr.bf16.mxu1 %v5353_v45  ;;  %v5437_v44 = vld [vmem:[#allocation2 + $0x86c] ss:$16 sps:$4 sm:$0xff]   ;;  %v5432_v45 = vld [vmem:[#allocation2 + $0x860] ss:$16 sps:$4 sm:$0xff]  }
 0x122   :  { %3423 = vmatpush1.bf16.msra.mxu0 %v5348_v46  ;;  %3751 = vmatpush1.bf16.msra.mxu1 %v5351_v47  ;;  %v5435_v46 = vld [vmem:[#allocation2 + $0x868] ss:$16 sps:$4 sm:$0xff]   ;;  %v5440_v47 = vld [vmem:[#allocation2 + $0x884] ss:$16 sps:$4 sm:$0xff]  }
 0x123   :  { %3424 = vmatprep.subr.bf16.mxu0 %v5356_v48  ;;  %3752 = vmatprep.subr.bf16.mxu1 %v5359_v50  ;;  %v5443_v48 = vld [vmem:[#allocation2 + $0x88c] ss:$16 sps:$4 sm:$0xff]   ;;  %v5438_v50 = vld [vmem:[#allocation2 + $0x880] ss:$16 sps:$4 sm:$0xff]  }
 0x126   :  { %3425 = vmatpush1.bf16.msra.mxu0 %v5354_v51  ;;  %3753 = vmatpush1.bf16.msra.mxu1 %v5357_v53  ;;  %v5441_v51 = vld [vmem:[#allocation2 + $0x888] ss:$16 sps:$4 sm:$0xff]   ;;  %v5446_v53 = vld [vmem:[#allocation2 + $0x8a4] ss:$16 sps:$4 sm:$0xff]  }
 0x127   :  { %3426 = vmatprep.subr.bf16.mxu0 %v5362_v54  ;;  %3754 = vmatprep.subr.bf16.mxu1 %v5365_v55  ;;  %v5449_v54 = vld [vmem:[#allocation2 + $0x8ac] ss:$16 sps:$4 sm:$0xff]   ;;  %v5444_v55 = vld [vmem:[#allocation2 + $0x8a0] ss:$16 sps:$4 sm:$0xff]  }
 0x12a   :  { %3427 = vmatpush1.bf16.msra.mxu0 %v5360_v56  ;;  %3755 = vmatpush1.bf16.msra.mxu1 %v5363_v57  ;;  %v5447_v56 = vld [vmem:[#allocation2 + $0x8a8] ss:$16 sps:$4 sm:$0xff]   ;;  %v5452_v57 = vld [vmem:[#allocation2 + $0x8c4] ss:$16 sps:$4 sm:$0xff]  }
 0x12b   :  { %3428 = vmatprep.subr.bf16.mxu0 %v5368_v58  ;;  %3756 = vmatprep.subr.bf16.mxu1 %v5371_v59  ;;  %v5455_v58 = vld [vmem:[#allocation2 + $0x8cc] ss:$16 sps:$4 sm:$0xff]   ;;  %v5450_v59 = vld [vmem:[#allocation2 + $0x8c0] ss:$16 sps:$4 sm:$0xff]  }
 0x12e   :  { %3429 = vmatpush1.bf16.msra.mxu0 %v5366_v60  ;;  %3757 = vmatpush1.bf16.msra.mxu1 %v5369_v61  ;;  %v5453_v60 = vld [vmem:[#allocation2 + $0x8c8] ss:$16 sps:$4 sm:$0xff]   ;;  %v5458_v61 = vld [vmem:[#allocation2 + $0x8e4] ss:$16 sps:$4 sm:$0xff]  }
 0x12f   :  { %3430 = vmatprep.subr.bf16.mxu0 %v5374_v62  ;;  %3758 = vmatprep.subr.bf16.mxu1 %v5377_v63  ;;  %v5461_v62 = vld [vmem:[#allocation2 + $0x8ec] ss:$16 sps:$4 sm:$0xff]   ;;  %v5456_v63 = vld [vmem:[#allocation2 + $0x8e0] ss:$16 sps:$4 sm:$0xff]  }
 0x132   :  { %3431 = vmatpush1.bf16.msra.mxu0 %v5372_v0  ;;  %3759 = vmatpush1.bf16.msra.mxu1 %v5375_v1  ;;  %v5459_v0 = vld [vmem:[#allocation2 + $0x8e8] ss:$16 sps:$4 sm:$0xff]   ;;  %v5464_v1 = vld [vmem:[#allocation2 + $0x904] ss:$16 sps:$4 sm:$0xff]  }
 0x133   :  { %3432 = vmatprep.subr.bf16.mxu0 %v5380_v2  ;;  %3760 = vmatprep.subr.bf16.mxu1 %v5383_v3  ;;  %v5467_v2 = vld [vmem:[#allocation2 + $0x90c] ss:$16 sps:$4 sm:$0xff]   ;;  %v5462_v3 = vld [vmem:[#allocation2 + $0x900] ss:$16 sps:$4 sm:$0xff]  }
 0x136   :  { %3433 = vmatpush1.bf16.msra.mxu0 %v5378_v4  ;;  %3761 = vmatpush1.bf16.msra.mxu1 %v5381_v5  ;;  %v5465_v4 = vld [vmem:[#allocation2 + $0x908] ss:$16 sps:$4 sm:$0xff]   ;;  %v5470_v5 = vld [vmem:[#allocation2 + $0x924] ss:$16 sps:$4 sm:$0xff]  }
 0x137   :  { %3434 = vmatprep.subr.bf16.mxu0 %v5386_v6  ;;  %3762 = vmatprep.subr.bf16.mxu1 %v5389_v7  ;;  %v5473_v6 = vld [vmem:[#allocation2 + $0x92c] ss:$16 sps:$4 sm:$0xff]   ;;  %v5468_v7 = vld [vmem:[#allocation2 + $0x920] ss:$16 sps:$4 sm:$0xff]  }
 0x13a   :  { %3435 = vmatpush1.bf16.msra.mxu0 %v5384_v8  ;;  %3763 = vmatpush1.bf16.msra.mxu1 %v5387_v9  ;;  %v5471_v8 = vld [vmem:[#allocation2 + $0x928] ss:$16 sps:$4 sm:$0xff]   ;;  %v5476_v9 = vld [vmem:[#allocation2 + $0x944] ss:$16 sps:$4 sm:$0xff]  }
 0x13b   :  { %3436 = vmatprep.subr.bf16.mxu0 %v5392_v10  ;;  %3764 = vmatprep.subr.bf16.mxu1 %v5395_v11  ;;  %v5479_v10 = vld [vmem:[#allocation2 + $0x94c] ss:$16 sps:$4 sm:$0xff]   ;;  %v5474_v11 = vld [vmem:[#allocation2 + $0x940] ss:$16 sps:$4 sm:$0xff]  }
 0x13e   :  { %3437 = vmatpush1.bf16.msra.mxu0 %v5390_v12  ;;  %3765 = vmatpush1.bf16.msra.mxu1 %v5393_v14  ;;  %v5477_v12 = vld [vmem:[#allocation2 + $0x948] ss:$16 sps:$4 sm:$0xff]   ;;  %v5482_v14 = vld [vmem:[#allocation2 + $0x964] ss:$16 sps:$4 sm:$0xff]  }
 0x13f   :  { %3438 = vmatprep.subr.bf16.mxu0 %v5398_v16  ;;  %3766 = vmatprep.subr.bf16.mxu1 %v5401_v17  ;;  %v5485_v16 = vld [vmem:[#allocation2 + $0x96c] ss:$16 sps:$4 sm:$0xff]   ;;  %v5480_v17 = vld [vmem:[#allocation2 + $0x960] ss:$16 sps:$4 sm:$0xff]  }
 0x142   :  { %3439 = vmatpush1.bf16.msra.mxu0 %v5396_v18  ;;  %3767 = vmatpush1.bf16.msra.mxu1 %v5399_v19  ;;  %v5483_v18 = vld [vmem:[#allocation2 + $0x968] ss:$16 sps:$4 sm:$0xff]   ;;  %v5488_v19 = vld [vmem:[#allocation2 + $0x984] ss:$16 sps:$4 sm:$0xff]  }
 0x143   :  { %3440 = vmatprep.subr.bf16.mxu0 %v5404_v52  ;;  %3768 = vmatprep.subr.bf16.mxu1 %v5407_v20  ;;  %v5491_v52 = vld [vmem:[#allocation2 + $0x98c] ss:$16 sps:$4 sm:$0xff]   ;;  %v5486_v20 = vld [vmem:[#allocation2 + $0x980] ss:$16 sps:$4 sm:$0xff]  }
 0x146   :  { %3441 = vmatpush1.bf16.msra.mxu0 %v5402_v22  ;;  %3769 = vmatpush1.bf16.msra.mxu1 %v5405_v23  ;;  %v5489_v22 = vld [vmem:[#allocation2 + $0x988] ss:$16 sps:$4 sm:$0xff]   ;;  %v5494_v23 = vld [vmem:[#allocation2 + $0x9a4] ss:$16 sps:$4 sm:$0xff]  }
 0x147   :  { %3442 = vmatprep.subr.bf16.mxu0 %v5410_v24  ;;  %3770 = vmatprep.subr.bf16.mxu1 %v5413_v26  ;;  %v5497_v24 = vld [vmem:[#allocation2 + $0x9ac] ss:$16 sps:$4 sm:$0xff]   ;;  %v5492_v26 = vld [vmem:[#allocation2 + $0x9a0] ss:$16 sps:$4 sm:$0xff]  }
 0x14a   :  { %3443 = vmatpush1.bf16.msra.mxu0 %v5408_v13  ;;  %3771 = vmatpush1.bf16.msra.mxu1 %v5411_v29  ;;  %v5495_v13 = vld [vmem:[#allocation2 + $0x9a8] ss:$16 sps:$4 sm:$0xff]   ;;  %v5500_v29 = vld [vmem:[#allocation2 + $0x9c4] ss:$16 sps:$4 sm:$0xff]  }
 0x14b   :  { %3453 = vmatprep.subr.bf16.mxu0 %v5416_v30  ;;  %3781 = vmatprep.subr.bf16.mxu1 %v5419_v31  ;;  %v5503_v30 = vld [vmem:[#allocation2 + $0x9cc] ss:$16 sps:$4 sm:$0xff]   ;;  %v5498_v31 = vld [vmem:[#allocation2 + $0x9c0] ss:$16 sps:$4 sm:$0xff]  }
 0x14d   :  { %3445 = vmatmul.mubr.bf16.vlgmr.msra.gmra.mrb[0].mxu0 %v640_v15  ;;  %3773 = vmatmul.mubr.bf16.vlgmr.msra.gmra.mrb[0].mxu1 %v640_v15  ;;  %v5506_v15 = vld [vmem:[#allocation2 + $0x9e4] ss:$16 sps:$4 sm:$0xff]  }
 0x14e   :  { %3454 = vmatpush1.bf16.msra.mxu0 %v5414_v33  ;;  %3782 = vmatpush1.bf16.msra.mxu1 %v5417_v34  ;;  %v5509_v33 = vld [vmem:[#allocation2 + $0x9ec] ss:$16 sps:$4 sm:$0xff]   ;;  %v5504_v34 = vld [vmem:[#allocation2 + $0x9e0] ss:$16 sps:$4 sm:$0xff]  }
 0x14f   :  { %3455 = vmatprep.subr.bf16.mxu0 %v5422_v35  ;;  %3783 = vmatprep.subr.bf16.mxu1 %v5425_v25  ;;  %v5507_v35 = vld [vmem:[#allocation2 + $0x9e8] ss:$16 sps:$4 sm:$0xff]   ;;  %v5512_v25 = vld [vmem:[#allocation2 + $0xa04] ss:$16 sps:$4 sm:$0xff]  }
 0x150   :  { %3485 = vmatprep.mubr.bf16.mxu0 %v6135_v36  ;;  %3813 = vmatprep.mubr.bf16.mxu1 %v6135_v36 }
 0x152   :  { %3456 = vmatpush1.bf16.msra.mxu0 %v5420_v37  ;;  %3784 = vmatpush1.bf16.msra.mxu1 %v5423_v38  ;;  %v5515_v37 = vld [vmem:[#allocation2 + $0xa0c] ss:$16 sps:$4 sm:$0xff]   ;;  %v6141_v38 = vrot.slane %v6128_v28, %v6084_v49  ;;  %v5519_v28 = vld [vmem:[#allocation2 + $0xa28] ss:$16 sps:$4 sm:$0xff]  }
 0x153   :  { %3457 = vmatprep.subr.bf16.mxu0 %v5428_v27  ;;  %3785 = vmatprep.subr.bf16.mxu1 %v5431_v39  ;;  %v5510_v27 = vld [vmem:[#allocation2 + $0xa00] ss:$16 sps:$4 sm:$0xff]   ;;  %v5513_v39 = vld [vmem:[#allocation2 + $0xa08] ss:$16 sps:$4 sm:$0xff]  }
 0x156   :  { %3458 = vmatpush1.bf16.msra.mxu0 %v5426_v40  ;;  %3786 = vmatpush1.bf16.msra.mxu1 %v5429_v41  ;;  %v5518_v40 = vld [vmem:[#allocation2 + $0xa24] ss:$16 sps:$4 sm:$0xff]   ;;  %v5521_v41 = vld [vmem:[#allocation2 + $0xa2c] ss:$16 sps:$4 sm:$0xff]  }
 0x157   :  { %3459 = vmatprep.subr.bf16.mxu0 %v5434_v42  ;;  %3787 = vmatprep.subr.bf16.mxu1 %v5437_v44  ;;  %v690_v42 = vcombine.high %v6135_v36, %v6135_v36  ;;  %v5516_v44 = vld [vmem:[#allocation2 + $0xa20] ss:$16 sps:$4 sm:$0xff]   ;;  %v5530_v36 = vld [vmem:[#allocation2 + $0xa64] ss:$16 sps:$4 sm:$0xff]  }
 0x15a   :  { %3460 = vmatpush1.bf16.msra.mxu0 %v5432_v45  ;;  %3788 = vmatpush1.bf16.msra.mxu1 %v5435_v46  ;;  %v5524_v45 = vld [vmem:[#allocation2 + $0xa44] ss:$16 sps:$4 sm:$0xff]   ;;  %v5527_v46 = vld [vmem:[#allocation2 + $0xa4c] ss:$16 sps:$4 sm:$0xff]  }
 0x15b   :  { %3461 = vmatprep.subr.bf16.mxu0 %v5440_v47  ;;  %3789 = vmatprep.subr.bf16.mxu1 %v5443_v48  ;;  %v5522_v47 = vld [vmem:[#allocation2 + $0xa40] ss:$16 sps:$4 sm:$0xff]   ;;  %v5525_v48 = vld [vmem:[#allocation2 + $0xa48] ss:$16 sps:$4 sm:$0xff]  }
 0x15e   :  { %3462 = vmatpush1.bf16.msra.mxu0 %v5438_v50  ;;  %3790 = vmatpush1.bf16.msra.mxu1 %v5441_v51  ;;  %v5533_v50 = vld [vmem:[#allocation2 + $0xa6c] ss:$16 sps:$4 sm:$0xff]   ;;  %v5528_v51 = vld [vmem:[#allocation2 + $0xa60] ss:$16 sps:$4 sm:$0xff]  }
 0x15f   :  { %3463 = vmatprep.subr.bf16.mxu0 %v5446_v53  ;;  %3791 = vmatprep.subr.bf16.mxu1 %v5449_v54  ;;  %v5531_v53 = vld [vmem:[#allocation2 + $0xa68] ss:$16 sps:$4 sm:$0xff]   ;;  %v5536_v54 = vld [vmem:[#allocation2 + $0xa84] ss:$16 sps:$4 sm:$0xff]  }
 0x162   :  { %3464 = vmatpush1.bf16.msra.mxu0 %v5444_v55  ;;  %3792 = vmatpush1.bf16.msra.mxu1 %v5447_v56  ;;  %v5539_v55 = vld [vmem:[#allocation2 + $0xa8c] ss:$16 sps:$4 sm:$0xff]   ;;  %v5534_v56 = vld [vmem:[#allocation2 + $0xa80] ss:$16 sps:$4 sm:$0xff]  }
 0x163   :  { %3465 = vmatprep.subr.bf16.mxu0 %v5452_v57  ;;  %3793 = vmatprep.subr.bf16.mxu1 %v5455_v58  ;;  %v5537_v57 = vld [vmem:[#allocation2 + $0xa88] ss:$16 sps:$4 sm:$0xff]   ;;  %v5542_v58 = vld [vmem:[#allocation2 + $0xaa4] ss:$16 sps:$4 sm:$0xff]  }
 0x166   :  { %3466 = vmatpush1.bf16.msra.mxu0 %v5450_v59  ;;  %3794 = vmatpush1.bf16.msra.mxu1 %v5453_v60  ;;  %v5545_v59 = vld [vmem:[#allocation2 + $0xaac] ss:$16 sps:$4 sm:$0xff]   ;;  %v5540_v60 = vld [vmem:[#allocation2 + $0xaa0] ss:$16 sps:$4 sm:$0xff]  }
 0x167   :  { %3467 = vmatprep.subr.bf16.mxu0 %v5458_v61  ;;  %3795 = vmatprep.subr.bf16.mxu1 %v5461_v62  ;;  %v5543_v61 = vld [vmem:[#allocation2 + $0xaa8] ss:$16 sps:$4 sm:$0xff]   ;;  %v5548_v62 = vld [vmem:[#allocation2 + $0xac4] ss:$16 sps:$4 sm:$0xff]  }
 0x16a   :  { %3468 = vmatpush1.bf16.msra.mxu0 %v5456_v63  ;;  %3796 = vmatpush1.bf16.msra.mxu1 %v5459_v0  ;;  %v5551_v63 = vld [vmem:[#allocation2 + $0xacc] ss:$16 sps:$4 sm:$0xff]   ;;  %v5546_v0 = vld [vmem:[#allocation2 + $0xac0] ss:$16 sps:$4 sm:$0xff]  }
 0x16b   :  { %3469 = vmatprep.subr.bf16.mxu0 %v5464_v1  ;;  %3797 = vmatprep.subr.bf16.mxu1 %v5467_v2  ;;  %v5549_v1 = vld [vmem:[#allocation2 + $0xac8] ss:$16 sps:$4 sm:$0xff]   ;;  %v5554_v2 = vld [vmem:[#allocation2 + $0xae4] ss:$16 sps:$4 sm:$0xff]  }
 0x16e   :  { %3470 = vmatpush1.bf16.msra.mxu0 %v5462_v3  ;;  %3798 = vmatpush1.bf16.msra.mxu1 %v5465_v4  ;;  %v5557_v3 = vld [vmem:[#allocation2 + $0xaec] ss:$16 sps:$4 sm:$0xff]   ;;  %v5552_v4 = vld [vmem:[#allocation2 + $0xae0] ss:$16 sps:$4 sm:$0xff]  }
 0x16f   :  { %3471 = vmatprep.subr.bf16.mxu0 %v5470_v5  ;;  %3799 = vmatprep.subr.bf16.mxu1 %v5473_v6  ;;  %v5555_v5 = vld [vmem:[#allocation2 + $0xae8] ss:$16 sps:$4 sm:$0xff]   ;;  %v5560_v6 = vld [vmem:[#allocation2 + $0xb04] ss:$16 sps:$4 sm:$0xff]  }
 0x172   :  { %3472 = vmatpush1.bf16.msra.mxu0 %v5468_v7  ;;  %3800 = vmatpush1.bf16.msra.mxu1 %v5471_v8  ;;  %v5563_v7 = vld [vmem:[#allocation2 + $0xb0c] ss:$16 sps:$4 sm:$0xff]   ;;  %v5558_v8 = vld [vmem:[#allocation2 + $0xb00] ss:$16 sps:$4 sm:$0xff]  }
 0x173   :  { %3473 = vmatprep.subr.bf16.mxu0 %v5476_v9  ;;  %3801 = vmatprep.subr.bf16.mxu1 %v5479_v10  ;;  %v5561_v9 = vld [vmem:[#allocation2 + $0xb08] ss:$16 sps:$4 sm:$0xff]   ;;  %v5566_v10 = vld [vmem:[#allocation2 + $0xb24] ss:$16 sps:$4 sm:$0xff]  }
 0x176   :  { %3474 = vmatpush1.bf16.msra.mxu0 %v5474_v11  ;;  %3802 = vmatpush1.bf16.msra.mxu1 %v5477_v12  ;;  %v5569_v11 = vld [vmem:[#allocation2 + $0xb2c] ss:$16 sps:$4 sm:$0xff]   ;;  %v5564_v12 = vld [vmem:[#allocation2 + $0xb20] ss:$16 sps:$4 sm:$0xff]  }
 0x177   :  { %3475 = vmatprep.subr.bf16.mxu0 %v5482_v14  ;;  %3803 = vmatprep.subr.bf16.mxu1 %v5485_v16  ;;  %v5567_v14 = vld [vmem:[#allocation2 + $0xb28] ss:$16 sps:$4 sm:$0xff]   ;;  %v5572_v16 = vld [vmem:[#allocation2 + $0xb44] ss:$16 sps:$4 sm:$0xff]  }
 0x17a   :  { %3476 = vmatpush1.bf16.msra.mxu0 %v5480_v17  ;;  %3804 = vmatpush1.bf16.msra.mxu1 %v5483_v18  ;;  %v5575_v17 = vld [vmem:[#allocation2 + $0xb4c] ss:$16 sps:$4 sm:$0xff]   ;;  %v5570_v18 = vld [vmem:[#allocation2 + $0xb40] ss:$16 sps:$4 sm:$0xff]  }
 0x17b   :  { %3477 = vmatprep.subr.bf16.mxu0 %v5488_v19  ;;  %3805 = vmatprep.subr.bf16.mxu1 %v5491_v52  ;;  %v5573_v19 = vld [vmem:[#allocation2 + $0xb48] ss:$16 sps:$4 sm:$0xff]   ;;  %v5578_v52 = vld [vmem:[#allocation2 + $0xb64] ss:$16 sps:$4 sm:$0xff]  }
 0x17e   :  { %3478 = vmatpush1.bf16.msra.mxu0 %v5486_v20  ;;  %3806 = vmatpush1.bf16.msra.mxu1 %v5489_v22  ;;  %v5581_v20 = vld [vmem:[#allocation2 + $0xb6c] ss:$16 sps:$4 sm:$0xff]   ;;  %v5576_v22 = vld [vmem:[#allocation2 + $0xb60] ss:$16 sps:$4 sm:$0xff]  }
 0x17f   :  { %3479 = vmatprep.subr.bf16.mxu0 %v5494_v23  ;;  %3807 = vmatprep.subr.bf16.mxu1 %v5497_v24  ;;  %v5579_v23 = vld [vmem:[#allocation2 + $0xb68] ss:$16 sps:$4 sm:$0xff]   ;;  %v5584_v24 = vld [vmem:[#allocation2 + $0xb84] ss:$16 sps:$4 sm:$0xff]  }
 0x182   :  { %3480 = vmatpush1.bf16.msra.mxu0 %v5492_v26  ;;  %3808 = vmatpush1.bf16.msra.mxu1 %v5495_v13  ;;  %v5587_v26 = vld [vmem:[#allocation2 + $0xb8c] ss:$16 sps:$4 sm:$0xff]   ;;  %v5582_v13 = vld [vmem:[#allocation2 + $0xb80] ss:$16 sps:$4 sm:$0xff]  }
 0x183   :  { %3481 = vmatprep.subr.bf16.mxu0 %v5500_v29  ;;  %3809 = vmatprep.subr.bf16.mxu1 %v5503_v30  ;;  %v5585_v29 = vld [vmem:[#allocation2 + $0xb88] ss:$16 sps:$4 sm:$0xff]   ;;  %v5590_v30 = vld [vmem:[#allocation2 + $0xba4] ss:$16 sps:$4 sm:$0xff]  }
 0x186   :  { %3482 = vmatpush1.bf16.msra.mxu0 %v5498_v31  ;;  %3810 = vmatpush1.bf16.msra.mxu1 %v5501_v32  ;;  %v5593_v31 = vld [vmem:[#allocation2 + $0xbac] ss:$16 sps:$4 sm:$0xff]   ;;  %v5588_v32 = vld [vmem:[#allocation2 + $0xba0] ss:$16 sps:$4 sm:$0xff]  }
 0x187   :  { %3483 = vmatprep.subr.bf16.mxu0 %v5506_v15  ;;  %3811 = vmatprep.subr.bf16.mxu1 %v5509_v33  ;;  %v5591_v15 = vld [vmem:[#allocation2 + $0xba8] ss:$16 sps:$4 sm:$0xff]   ;;  %v5596_v33 = vld [vmem:[#allocation2 + $0xbc4] ss:$16 sps:$4 sm:$0xff]  }
 0x18a   :  { %3484 = vmatpush1.bf16.msra.mxu0 %v5504_v34  ;;  %3812 = vmatpush1.bf16.msra.mxu1 %v5507_v35  ;;  %v5599_v34 = vld [vmem:[#allocation2 + $0xbcc] ss:$16 sps:$4 sm:$0xff]   ;;  %v643_v35 = vcombine.high %v6124_v21, %v6124_v21 }
 0x18b   :  { %3494 = vmatprep.subr.bf16.mxu0 %v5512_v25  ;;  %3822 = vmatprep.subr.bf16.mxu1 %v5515_v37  ;;  %v5594_v25 = vld [vmem:[#allocation2 + $0xbc0] ss:$16 sps:$4 sm:$0xff]   ;;  %v5597_v37 = vld [vmem:[#allocation2 + $0xbc8] ss:$16 sps:$4 sm:$0xff]  }
 0x18d   :  { %3486 = vmatmul.mubr.bf16.vlgmr.msra.gmra.mrb[0].mxu0 %v6141_v38  ;;  %3814 = vmatmul.mubr.bf16.vlgmr.msra.gmra.mrb[0].mxu1 %v6141_v38 }
 0x18e   :  { %3495 = vmatpush1.bf16.msra.mxu0 %v5510_v27  ;;  %3823 = vmatpush1.bf16.msra.mxu1 %v5513_v39  ;;  %v5602_v27 = vld [vmem:[#allocation2 + $0xbe4] ss:$16 sps:$4 sm:$0xff]   ;;  %v5605_v39 = vld [vmem:[#allocation2 + $0xbec] ss:$16 sps:$4 sm:$0xff]  }
 0x18f   :  { %3496 = vmatprep.subr.bf16.mxu0 %v5518_v40  ;;  %3824 = vmatprep.subr.bf16.mxu1 %v5521_v41  ;;  %v6150_v40 = vrot.slane %v643_v35, %v6084_v49  ;;  %v5600_v41 = vld [vmem:[#allocation2 + $0xbe0] ss:$16 sps:$4 sm:$0xff]   ;;  %v5681_v35 = vld [vmem:[#allocation2 + $0xd88] ss:$16 sps:$4 sm:$0xff]  }
 0x190   :  { %3526 = vmatprep.mubr.bf16.mxu0 %v690_v42  ;;  %3854 = vmatprep.mubr.bf16.mxu1 %v690_v42  ;;  %v5603_v42 = vld [vmem:[#allocation2 + $0xbe8] ss:$16 sps:$4 sm:$0xff]  }
 0x191   :  { %v659_v21 = vcombine.high %v6150_v40, %v6150_v40 }
 0x192   :  { %3497 = vmatpush1.bf16.msra.mxu0 %v5516_v44  ;;  %3825 = vmatpush1.bf16.msra.mxu1 %v5519_v28  ;;  %v5608_v44 = vld [vmem:[#allocation2 + $0xc04] ss:$16 sps:$4 sm:$0xff]   ;;  %v5611_v28 = vld [vmem:[#allocation2 + $0xc0c] ss:$16 sps:$4 sm:$0xff]  }
 0x193   :  { %3498 = vmatprep.subr.bf16.mxu0 %v5524_v45  ;;  %3826 = vmatprep.subr.bf16.mxu1 %v5527_v46  ;;  %v688_v45 = vcombine.high %v6141_v38, %v6141_v38  ;;  %v5606_v46 = vld [vmem:[#allocation2 + $0xc00] ss:$16 sps:$4 sm:$0xff]   ;;  %v5620_v38 = vld [vmem:[#allocation2 + $0xc44] ss:$16 sps:$4 sm:$0xff]  }
 0x196   :  { %3499 = vmatpush1.bf16.msra.mxu0 %v5522_v47  ;;  %3827 = vmatpush1.bf16.msra.mxu1 %v5525_v48  ;;  %v5609_v47 = vld [vmem:[#allocation2 + $0xc08] ss:$16 sps:$4 sm:$0xff]   ;;  %v5614_v48 = vld [vmem:[#allocation2 + $0xc24] ss:$16 sps:$4 sm:$0xff]  }
 0x197   :  { %3500 = vmatprep.subr.bf16.mxu0 %v5530_v36  ;;  %3828 = vmatprep.subr.bf16.mxu1 %v5533_v50  ;;  %v5617_v36 = vld [vmem:[#allocation2 + $0xc2c] ss:$16 sps:$4 sm:$0xff]   ;;  %v6157_v50 = vrot.slane %v659_v21, %v6084_v49  ;;  %v5698_v21 = vld [vmem:[#allocation2 + $0xde4] ss:$16 sps:$4 sm:$0xff]  }
 0x19a   :  { %3501 = vmatpush1.bf16.msra.mxu0 %v5528_v51  ;;  %3829 = vmatpush1.bf16.msra.mxu1 %v5531_v53  ;;  %v5612_v51 = vld [vmem:[#allocation2 + $0xc20] ss:$16 sps:$4 sm:$0xff]   ;;  %v5615_v53 = vld [vmem:[#allocation2 + $0xc28] ss:$16 sps:$4 sm:$0xff]  }
 0x19b   :  { %3502 = vmatprep.subr.bf16.mxu0 %v5536_v54  ;;  %3830 = vmatprep.subr.bf16.mxu1 %v5539_v55  ;;  %v5623_v54 = vld [vmem:[#allocation2 + $0xc4c] ss:$16 sps:$4 sm:$0xff]   ;;  %v5618_v55 = vld [vmem:[#allocation2 + $0xc40] ss:$16 sps:$4 sm:$0xff]  }
 0x19e   :  { %3503 = vmatpush1.bf16.msra.mxu0 %v5534_v56  ;;  %3831 = vmatpush1.bf16.msra.mxu1 %v5537_v57  ;;  %v5621_v56 = vld [vmem:[#allocation2 + $0xc48] ss:$16 sps:$4 sm:$0xff]   ;;  %v5626_v57 = vld [vmem:[#allocation2 + $0xc64] ss:$16 sps:$4 sm:$0xff]  }
 0x19f   :  { %3504 = vmatprep.subr.bf16.mxu0 %v5542_v58  ;;  %3832 = vmatprep.subr.bf16.mxu1 %v5545_v59  ;;  %v5629_v58 = vld [vmem:[#allocation2 + $0xc6c] ss:$16 sps:$4 sm:$0xff]   ;;  %v5624_v59 = vld [vmem:[#allocation2 + $0xc60] ss:$16 sps:$4 sm:$0xff]  }
 0x1a2   :  { %3505 = vmatpush1.bf16.msra.mxu0 %v5540_v60  ;;  %3833 = vmatpush1.bf16.msra.mxu1 %v5543_v61  ;;  %v5627_v60 = vld [vmem:[#allocation2 + $0xc68] ss:$16 sps:$4 sm:$0xff]   ;;  %v5632_v61 = vld [vmem:[#allocation2 + $0xc84] ss:$16 sps:$4 sm:$0xff]  }
 0x1a3   :  { %3506 = vmatprep.subr.bf16.mxu0 %v5548_v62  ;;  %3834 = vmatprep.subr.bf16.mxu1 %v5551_v63  ;;  %v5635_v62 = vld [vmem:[#allocation2 + $0xc8c] ss:$16 sps:$4 sm:$0xff]   ;;  %v5630_v63 = vld [vmem:[#allocation2 + $0xc80] ss:$16 sps:$4 sm:$0xff]  }
 0x1a6   :  { %3507 = vmatpush1.bf16.msra.mxu0 %v5546_v0  ;;  %3835 = vmatpush1.bf16.msra.mxu1 %v5549_v1  ;;  %v5633_v0 = vld [vmem:[#allocation2 + $0xc88] ss:$16 sps:$4 sm:$0xff]   ;;  %v5638_v1 = vld [vmem:[#allocation2 + $0xca4] ss:$16 sps:$4 sm:$0xff]  }
 0x1a7   :  { %3508 = vmatprep.subr.bf16.mxu0 %v5554_v2  ;;  %3836 = vmatprep.subr.bf16.mxu1 %v5557_v3  ;;  %v5641_v2 = vld [vmem:[#allocation2 + $0xcac] ss:$16 sps:$4 sm:$0xff]   ;;  %v5636_v3 = vld [vmem:[#allocation2 + $0xca0] ss:$16 sps:$4 sm:$0xff]  }
 0x1aa   :  { %3509 = vmatpush1.bf16.msra.mxu0 %v5552_v4  ;;  %3837 = vmatpush1.bf16.msra.mxu1 %v5555_v5  ;;  %v5639_v4 = vld [vmem:[#allocation2 + $0xca8] ss:$16 sps:$4 sm:$0xff]   ;;  %v5644_v5 = vld [vmem:[#allocation2 + $0xcc4] ss:$16 sps:$4 sm:$0xff]  }
 0x1ab   :  { %3510 = vmatprep.subr.bf16.mxu0 %v5560_v6  ;;  %3838 = vmatprep.subr.bf16.mxu1 %v5563_v7  ;;  %v5647_v6 = vld [vmem:[#allocation2 + $0xccc] ss:$16 sps:$4 sm:$0xff]   ;;  %v5642_v7 = vld [vmem:[#allocation2 + $0xcc0] ss:$16 sps:$4 sm:$0xff]  }
 0x1ae   :  { %3511 = vmatpush1.bf16.msra.mxu0 %v5558_v8  ;;  %3839 = vmatpush1.bf16.msra.mxu1 %v5561_v9  ;;  %v5645_v8 = vld [vmem:[#allocation2 + $0xcc8] ss:$16 sps:$4 sm:$0xff]   ;;  %v5650_v9 = vld [vmem:[#allocation2 + $0xce4] ss:$16 sps:$4 sm:$0xff]  }
 0x1af   :  { %3512 = vmatprep.subr.bf16.mxu0 %v5566_v10  ;;  %3840 = vmatprep.subr.bf16.mxu1 %v5569_v11  ;;  %v5653_v10 = vld [vmem:[#allocation2 + $0xcec] ss:$16 sps:$4 sm:$0xff]   ;;  %v5648_v11 = vld [vmem:[#allocation2 + $0xce0] ss:$16 sps:$4 sm:$0xff]  }
 0x1b2   :  { %3513 = vmatpush1.bf16.msra.mxu0 %v5564_v12  ;;  %3841 = vmatpush1.bf16.msra.mxu1 %v5567_v14  ;;  %v5651_v12 = vld [vmem:[#allocation2 + $0xce8] ss:$16 sps:$4 sm:$0xff]   ;;  %v5656_v14 = vld [vmem:[#allocation2 + $0xd04] ss:$16 sps:$4 sm:$0xff]  }
 0x1b3   :  { %3514 = vmatprep.subr.bf16.mxu0 %v5572_v16  ;;  %3842 = vmatprep.subr.bf16.mxu1 %v5575_v17  ;;  %v5659_v16 = vld [vmem:[#allocation2 + $0xd0c] ss:$16 sps:$4 sm:$0xff]   ;;  %v5654_v17 = vld [vmem:[#allocation2 + $0xd00] ss:$16 sps:$4 sm:$0xff]  }
 0x1b6   :  { %3515 = vmatpush1.bf16.msra.mxu0 %v5570_v18  ;;  %3843 = vmatpush1.bf16.msra.mxu1 %v5573_v19  ;;  %v5657_v18 = vld [vmem:[#allocation2 + $0xd08] ss:$16 sps:$4 sm:$0xff]   ;;  %v5662_v19 = vld [vmem:[#allocation2 + $0xd24] ss:$16 sps:$4 sm:$0xff]  }
 0x1b7   :  { %3516 = vmatprep.subr.bf16.mxu0 %v5578_v52  ;;  %3844 = vmatprep.subr.bf16.mxu1 %v5581_v20  ;;  %v5665_v52 = vld [vmem:[#allocation2 + $0xd2c] ss:$16 sps:$4 sm:$0xff]   ;;  %v5660_v20 = vld [vmem:[#allocation2 + $0xd20] ss:$16 sps:$4 sm:$0xff]  }
 0x1ba   :  { %3517 = vmatpush1.bf16.msra.mxu0 %v5576_v22  ;;  %3845 = vmatpush1.bf16.msra.mxu1 %v5579_v23  ;;  %v5663_v22 = vld [vmem:[#allocation2 + $0xd28] ss:$16 sps:$4 sm:$0xff]   ;;  %v5668_v23 = vld [vmem:[#allocation2 + $0xd44] ss:$16 sps:$4 sm:$0xff]  }
 0x1bb   :  { %3518 = vmatprep.subr.bf16.mxu0 %v5584_v24  ;;  %3846 = vmatprep.subr.bf16.mxu1 %v5587_v26  ;;  %v5671_v24 = vld [vmem:[#allocation2 + $0xd4c] ss:$16 sps:$4 sm:$0xff]   ;;  %v5666_v26 = vld [vmem:[#allocation2 + $0xd40] ss:$16 sps:$4 sm:$0xff]  }
 0x1be   :  { %3519 = vmatpush1.bf16.msra.mxu0 %v5582_v13  ;;  %3847 = vmatpush1.bf16.msra.mxu1 %v5585_v29  ;;  %v5669_v13 = vld [vmem:[#allocation2 + $0xd48] ss:$16 sps:$4 sm:$0xff]   ;;  %v5674_v29 = vld [vmem:[#allocation2 + $0xd64] ss:$16 sps:$4 sm:$0xff]  }
 0x1bf   :  { %3520 = vmatprep.subr.bf16.mxu0 %v5590_v30  ;;  %3848 = vmatprep.subr.bf16.mxu1 %v5593_v31  ;;  %v5677_v30 = vld [vmem:[#allocation2 + $0xd6c] ss:$16 sps:$4 sm:$0xff]   ;;  %v5672_v31 = vld [vmem:[#allocation2 + $0xd60] ss:$16 sps:$4 sm:$0xff]  }
 0x1c2   :  { %3521 = vmatpush1.bf16.msra.mxu0 %v5588_v32  ;;  %3849 = vmatpush1.bf16.msra.mxu1 %v5591_v15  ;;  %v5675_v32 = vld [vmem:[#allocation2 + $0xd68] ss:$16 sps:$4 sm:$0xff]   ;;  %v5680_v15 = vld [vmem:[#allocation2 + $0xd84] ss:$16 sps:$4 sm:$0xff]  }
 0x1c3   :  { %3522 = vmatprep.subr.bf16.mxu0 %v5596_v33  ;;  %3850 = vmatprep.subr.bf16.mxu1 %v5599_v34  ;;  %v5683_v33 = vld [vmem:[#allocation2 + $0xd8c] ss:$16 sps:$4 sm:$0xff]   ;;  %v5678_v34 = vld [vmem:[#allocation2 + $0xd80] ss:$16 sps:$4 sm:$0xff]  }
 0x1c6   :  { %3523 = vmatpush1.bf16.msra.mxu0 %v5594_v25  ;;  %3851 = vmatpush1.bf16.msra.mxu1 %v5597_v37  ;;  %v5686_v25 = vld [vmem:[#allocation2 + $0xda4] ss:$16 sps:$4 sm:$0xff]   ;;  %v5689_v37 = vld [vmem:[#allocation2 + $0xdac] ss:$16 sps:$4 sm:$0xff]  }
 0x1c7   :  { %3524 = vmatprep.subr.bf16.mxu0 %v5602_v27  ;;  %3852 = vmatprep.subr.bf16.mxu1 %v5605_v39  ;;  %v5684_v27 = vld [vmem:[#allocation2 + $0xda0] ss:$16 sps:$4 sm:$0xff]   ;;  %v5687_v39 = vld [vmem:[#allocation2 + $0xda8] ss:$16 sps:$4 sm:$0xff]  }
 0x1ca   :  { %3525 = vmatpush1.bf16.msra.mxu0 %v5600_v41  ;;  %3853 = vmatpush1.bf16.msra.mxu1 %v5603_v42  ;;  %v5692_v41 = vld [vmem:[#allocation2 + $0xdc4] ss:$16 sps:$4 sm:$0xff]   ;;  %v5695_v42 = vld [vmem:[#allocation2 + $0xdcc] ss:$16 sps:$4 sm:$0xff]  }
 0x1cb   :  { %3535 = vmatprep.subr.bf16.mxu0 %v5608_v44  ;;  %3863 = vmatprep.subr.bf16.mxu1 %v5611_v28  ;;  %v5690_v44 = vld [vmem:[#allocation2 + $0xdc0] ss:$16 sps:$4 sm:$0xff]   ;;  %v5693_v28 = vld [vmem:[#allocation2 + $0xdc8] ss:$16 sps:$4 sm:$0xff]  }
 0x1cd   :  { %3527 = vmatmul.mubr.bf16.vlgmr.msra.gmra.mrb[0].mxu0 %v688_v45  ;;  %3855 = vmatmul.mubr.bf16.vlgmr.msra.gmra.mrb[0].mxu1 %v688_v45  ;;  %v5701_v45 = vld [vmem:[#allocation2 + $0xdec] ss:$16 sps:$4 sm:$0xff]  }
 0x1ce   :  { %3536 = vmatpush1.bf16.msra.mxu0 %v5606_v46  ;;  %3864 = vmatpush1.bf16.msra.mxu1 %v5609_v47  ;;  %v5696_v46 = vld [vmem:[#allocation2 + $0xde0] ss:$16 sps:$4 sm:$0xff]   ;;  %v5699_v47 = vld [vmem:[#allocation2 + $0xde8] ss:$16 sps:$4 sm:$0xff]  }
 0x1cf   :  { %3537 = vmatprep.subr.bf16.mxu0 %v5614_v48  ;;  %3865 = vmatprep.subr.bf16.mxu1 %v5617_v36  ;;  %v5705_v48 = vld [vmem:[#allocation2 + $0xe04] ss:$16 sps:$4 sm:$0xff]   ;;  %v5708_v36 = vld [vmem:[#allocation2 + $0xe0c] ss:$16 sps:$4 sm:$0xff]  }
 0x1d0   :  { %3567 = vmatprep.mubr.bf16.mxu0 %v6157_v50  ;;  %3895 = vmatprep.mubr.bf16.mxu1 %v6157_v50 }
 0x1d2   :  { %3538 = vmatpush1.bf16.msra.mxu0 %v5612_v51  ;;  %3866 = vmatpush1.bf16.msra.mxu1 %v5615_v53  ;;  %v6163_v51 = vrot.slane %v6150_v40, %v6084_v49  ;;  %v5703_v53 = vld [vmem:[#allocation2 + $0xe00] ss:$16 sps:$4 sm:$0xff]   ;;  %v5712_v49 = vld [vmem:[#allocation2 + $0xe28] ss:$16 sps:$4 sm:$0xff]   ;;  %v5717_v40 = vld [vmem:[#allocation2 + $0xe44] ss:$16 sps:$4 sm:$0xff]  }
 0x1d3   :  { %3539 = vmatprep.subr.bf16.mxu0 %v5620_v38  ;;  %3867 = vmatprep.subr.bf16.mxu1 %v5623_v54  ;;  %v5706_v38 = vld [vmem:[#allocation2 + $0xe08] ss:$16 sps:$4 sm:$0xff]   ;;  %v5711_v54 = vld [vmem:[#allocation2 + $0xe24] ss:$16 sps:$4 sm:$0xff]  }
 0x1d6   :  { %3540 = vmatpush1.bf16.msra.mxu0 %v5618_v55  ;;  %3868 = vmatpush1.bf16.msra.mxu1 %v5621_v56  ;;  %v5714_v55 = vld [vmem:[#allocation2 + $0xe2c] ss:$16 sps:$4 sm:$0xff]   ;;  %v691_v56 = vcombine.high %v6157_v50, %v6157_v50  ;;  %v5723_v50 = vld [vmem:[#allocation2 + $0xe64] ss:$16 sps:$4 sm:$0xff]  }
 0x1d7   :  { %3541 = vmatprep.subr.bf16.mxu0 %v5626_v57  ;;  %3869 = vmatprep.subr.bf16.mxu1 %v5629_v58  ;;  %v5709_v57 = vld [vmem:[#allocation2 + $0xe20] ss:$16 sps:$4 sm:$0xff]   ;;  %v5720_v58 = vld [vmem:[#allocation2 + $0xe4c] ss:$16 sps:$4 sm:$0xff]  }
 0x1da   :  { %3542 = vmatpush1.bf16.msra.mxu0 %v5624_v59  ;;  %3870 = vmatpush1.bf16.msra.mxu1 %v5627_v60  ;;  %v5715_v59 = vld [vmem:[#allocation2 + $0xe40] ss:$16 sps:$4 sm:$0xff]   ;;  %v5718_v60 = vld [vmem:[#allocation2 + $0xe48] ss:$16 sps:$4 sm:$0xff]  }
 0x1db   :  { %3543 = vmatprep.subr.bf16.mxu0 %v5632_v61  ;;  %3871 = vmatprep.subr.bf16.mxu1 %v5635_v62  ;;  %v5726_v61 = vld [vmem:[#allocation2 + $0xe6c] ss:$16 sps:$4 sm:$0xff]   ;;  %v5721_v62 = vld [vmem:[#allocation2 + $0xe60] ss:$16 sps:$4 sm:$0xff]  }
 0x1de   :  { %3544 = vmatpush1.bf16.msra.mxu0 %v5630_v63  ;;  %3872 = vmatpush1.bf16.msra.mxu1 %v5633_v0  ;;  %v5724_v63 = vld [vmem:[#allocation2 + $0xe68] ss:$16 sps:$4 sm:$0xff]   ;;  %v5729_v0 = vld [vmem:[#allocation2 + $0xe84] ss:$16 sps:$4 sm:$0xff]  }
 0x1df   :  { %3545 = vmatprep.subr.bf16.mxu0 %v5638_v1  ;;  %3873 = vmatprep.subr.bf16.mxu1 %v5641_v2  ;;  %v5732_v1 = vld [vmem:[#allocation2 + $0xe8c] ss:$16 sps:$4 sm:$0xff]   ;;  %v5727_v2 = vld [vmem:[#allocation2 + $0xe80] ss:$16 sps:$4 sm:$0xff]  }
 0x1e2   :  { %3546 = vmatpush1.bf16.msra.mxu0 %v5636_v3  ;;  %3874 = vmatpush1.bf16.msra.mxu1 %v5639_v4  ;;  %v5730_v3 = vld [vmem:[#allocation2 + $0xe88] ss:$16 sps:$4 sm:$0xff]   ;;  %v5735_v4 = vld [vmem:[#allocation2 + $0xea4] ss:$16 sps:$4 sm:$0xff]  }
 0x1e3   :  { %3547 = vmatprep.subr.bf16.mxu0 %v5644_v5  ;;  %3875 = vmatprep.subr.bf16.mxu1 %v5647_v6  ;;  %v5738_v5 = vld [vmem:[#allocation2 + $0xeac] ss:$16 sps:$4 sm:$0xff]   ;;  %v5733_v6 = vld [vmem:[#allocation2 + $0xea0] ss:$16 sps:$4 sm:$0xff]  }
 0x1e6   :  { %3548 = vmatpush1.bf16.msra.mxu0 %v5642_v7  ;;  %3876 = vmatpush1.bf16.msra.mxu1 %v5645_v8  ;;  %v5736_v7 = vld [vmem:[#allocation2 + $0xea8] ss:$16 sps:$4 sm:$0xff]   ;;  %v5741_v8 = vld [vmem:[#allocation2 + $0xec4] ss:$16 sps:$4 sm:$0xff]  }
 0x1e7   :  { %3549 = vmatprep.subr.bf16.mxu0 %v5650_v9  ;;  %3877 = vmatprep.subr.bf16.mxu1 %v5653_v10  ;;  %v5744_v9 = vld [vmem:[#allocation2 + $0xecc] ss:$16 sps:$4 sm:$0xff]   ;;  %v5739_v10 = vld [vmem:[#allocation2 + $0xec0] ss:$16 sps:$4 sm:$0xff]  }
 0x1ea   :  { %3550 = vmatpush1.bf16.msra.mxu0 %v5648_v11  ;;  %3878 = vmatpush1.bf16.msra.mxu1 %v5651_v12  ;;  %v5742_v11 = vld [vmem:[#allocation2 + $0xec8] ss:$16 sps:$4 sm:$0xff]   ;;  %v5747_v12 = vld [vmem:[#allocation2 + $0xee4] ss:$16 sps:$4 sm:$0xff]  }
 0x1eb   :  { %3551 = vmatprep.subr.bf16.mxu0 %v5656_v14  ;;  %3879 = vmatprep.subr.bf16.mxu1 %v5659_v16  ;;  %v5750_v14 = vld [vmem:[#allocation2 + $0xeec] ss:$16 sps:$4 sm:$0xff]   ;;  %v5745_v16 = vld [vmem:[#allocation2 + $0xee0] ss:$16 sps:$4 sm:$0xff]  }
 0x1ee   :  { %3552 = vmatpush1.bf16.msra.mxu0 %v5654_v17  ;;  %3880 = vmatpush1.bf16.msra.mxu1 %v5657_v18  ;;  %v5748_v17 = vld [vmem:[#allocation2 + $0xee8] ss:$16 sps:$4 sm:$0xff]   ;;  %v5753_v18 = vld [vmem:[#allocation2 + $0xf04] ss:$16 sps:$4 sm:$0xff]  }
 0x1ef   :  { %3553 = vmatprep.subr.bf16.mxu0 %v5662_v19  ;;  %3881 = vmatprep.subr.bf16.mxu1 %v5665_v52  ;;  %v5756_v19 = vld [vmem:[#allocation2 + $0xf0c] ss:$16 sps:$4 sm:$0xff]   ;;  %v5751_v52 = vld [vmem:[#allocation2 + $0xf00] ss:$16 sps:$4 sm:$0xff]  }
 0x1f2   :  { %3554 = vmatpush1.bf16.msra.mxu0 %v5660_v20  ;;  %3882 = vmatpush1.bf16.msra.mxu1 %v5663_v22  ;;  %v5754_v20 = vld [vmem:[#allocation2 + $0xf08] ss:$16 sps:$4 sm:$0xff]   ;;  %v5759_v22 = vld [vmem:[#allocation2 + $0xf24] ss:$16 sps:$4 sm:$0xff]  }
 0x1f3   :  { %3555 = vmatprep.subr.bf16.mxu0 %v5668_v23  ;;  %3883 = vmatprep.subr.bf16.mxu1 %v5671_v24  ;;  %v5762_v23 = vld [vmem:[#allocation2 + $0xf2c] ss:$16 sps:$4 sm:$0xff]   ;;  %v5757_v24 = vld [vmem:[#allocation2 + $0xf20] ss:$16 sps:$4 sm:$0xff]  }
 0x1f6   :  { %3556 = vmatpush1.bf16.msra.mxu0 %v5666_v26  ;;  %3884 = vmatpush1.bf16.msra.mxu1 %v5669_v13  ;;  %v5760_v26 = vld [vmem:[#allocation2 + $0xf28] ss:$16 sps:$4 sm:$0xff]   ;;  %v5765_v13 = vld [vmem:[#allocation2 + $0xf44] ss:$16 sps:$4 sm:$0xff]  }
 0x1f7   :  { %3557 = vmatprep.subr.bf16.mxu0 %v5674_v29  ;;  %3885 = vmatprep.subr.bf16.mxu1 %v5677_v30  ;;  %v5768_v29 = vld [vmem:[#allocation2 + $0xf4c] ss:$16 sps:$4 sm:$0xff]   ;;  %v5763_v30 = vld [vmem:[#allocation2 + $0xf40] ss:$16 sps:$4 sm:$0xff]  }
 0x1fa   :  { %3558 = vmatpush1.bf16.msra.mxu0 %v5672_v31  ;;  %3886 = vmatpush1.bf16.msra.mxu1 %v5675_v32  ;;  %v5766_v31 = vld [vmem:[#allocation2 + $0xf48] ss:$16 sps:$4 sm:$0xff]   ;;  %v5771_v32 = vld [vmem:[#allocation2 + $0xf64] ss:$16 sps:$4 sm:$0xff]  }
 0x1fb   :  { %3559 = vmatprep.subr.bf16.mxu0 %v5680_v15  ;;  %3887 = vmatprep.subr.bf16.mxu1 %v5683_v33  ;;  %v5774_v15 = vld [vmem:[#allocation2 + $0xf6c] ss:$16 sps:$4 sm:$0xff]   ;;  %v5769_v33 = vld [vmem:[#allocation2 + $0xf60] ss:$16 sps:$4 sm:$0xff]  }
 0x1fe   :  { %3560 = vmatpush1.bf16.msra.mxu0 %v5678_v34  ;;  %3888 = vmatpush1.bf16.msra.mxu1 %v5681_v35  ;;  %v5772_v34 = vld [vmem:[#allocation2 + $0xf68] ss:$16 sps:$4 sm:$0xff]   ;;  %v5777_v35 = vld [vmem:[#allocation2 + $0xf84] ss:$16 sps:$4 sm:$0xff]  }
 0x1ff   :  { %3561 = vmatprep.subr.bf16.mxu0 %v5686_v25  ;;  %3889 = vmatprep.subr.bf16.mxu1 %v5689_v37  ;;  %v5780_v25 = vld [vmem:[#allocation2 + $0xf8c] ss:$16 sps:$4 sm:$0xff]   ;;  %v5775_v37 = vld [vmem:[#allocation2 + $0xf80] ss:$16 sps:$4 sm:$0xff]  }
 0x202   :  { %3562 = vmatpush1.bf16.msra.mxu0 %v5684_v27  ;;  %3890 = vmatpush1.bf16.msra.mxu1 %v5687_v39  ;;  %v5778_v27 = vld [vmem:[#allocation2 + $0xf88] ss:$16 sps:$4 sm:$0xff]   ;;  %v5783_v39 = vld [vmem:[#allocation2 + $0xfa4] ss:$16 sps:$4 sm:$0xff]  }
 0x203   :  { %3563 = vmatprep.subr.bf16.mxu0 %v5692_v41  ;;  %3891 = vmatprep.subr.bf16.mxu1 %v5695_v42  ;;  %v5786_v41 = vld [vmem:[#allocation2 + $0xfac] ss:$16 sps:$4 sm:$0xff]   ;;  %v5781_v42 = vld [vmem:[#allocation2 + $0xfa0] ss:$16 sps:$4 sm:$0xff]  }
 0x206   :  { %3564 = vmatpush1.bf16.msra.mxu0 %v5690_v44  ;;  %3892 = vmatpush1.bf16.msra.mxu1 %v5693_v28  ;;  %v5784_v44 = vld [vmem:[#allocation2 + $0xfa8] ss:$16 sps:$4 sm:$0xff]   ;;  %v5789_v28 = vld [vmem:[#allocation2 + $0xfc4] ss:$16 sps:$4 sm:$0xff]  }
 0x207   :  { %3565 = vmatprep.subr.bf16.mxu0 %v5698_v21  ;;  %3893 = vmatprep.subr.bf16.mxu1 %v5701_v45  ;;  %v5792_v21 = vld [vmem:[#allocation2 + $0xfcc] ss:$16 sps:$4 sm:$0xff]   ;;  %v5787_v45 = vld [vmem:[#allocation2 + $0xfc0] ss:$16 sps:$4 sm:$0xff]  }
 0x20a   :  { %3566 = vmatpush1.bf16.msra.mxu0 %v5696_v46  ;;  %3894 = vmatpush1.bf16.msra.mxu1 %v5699_v47  ;;  %v5790_v46 = vld [vmem:[#allocation2 + $0xfc8] ss:$16 sps:$4 sm:$0xff]   ;;  %v5795_v47 = vld [vmem:[#allocation2 + $0xfe4] ss:$16 sps:$4 sm:$0xff]  }
 0x20b   :  { %3576 = vmatprep.subr.bf16.mxu0 %v5705_v48  ;;  %3904 = vmatprep.subr.bf16.mxu1 %v5708_v36  ;;  %v5798_v48 = vld [vmem:[#allocation2 + $0xfec] ss:$16 sps:$4 sm:$0xff]   ;;  %v5793_v36 = vld [vmem:[#allocation2 + $0xfe0] ss:$16 sps:$4 sm:$0xff]  }
 0x20d   :  { %3568 = vmatmul.mubr.bf16.vlgmr.msra.gmra.mrb[0].mxu0 %v6163_v51  ;;  %3896 = vmatmul.mubr.bf16.vlgmr.msra.gmra.mrb[0].mxu1 %v6163_v51 }
 0x20e   :  { %3577 = vmatpush1.bf16.msra.mxu0 %v5703_v53  ;;  %3905 = vmatpush1.bf16.msra.mxu1 %v5706_v38  ;;  %v5796_v53 = vld [vmem:[#allocation2 + $0xfe8] ss:$16 sps:$4 sm:$0xff]   ;;  %v5799_v38 = vld [vmem:[%s6300_s3 + $0x40] sm:$0xff]  }
 0x20f   :  { %3578 = vmatprep.subr.bf16.mxu0 %v5711_v54  ;;  %3906 = vmatprep.subr.bf16.mxu1 %v5714_v55  ;;  %v5800_v54 = vld [vmem:[%s6300_s3 + $0xc0] sm:$0xff]   ;;  %v689_v55 = vcombine.high %v6163_v51, %v6163_v51  ;;  %v5804_v51 = vld [vmem:[%s6300_s3 + $0xc8] sm:$0xff]  }
 0x210   :  { %3608 = vmatprep.mubr.bf16.mxu0 %v691_v56  ;;  %3936 = vmatprep.mubr.bf16.mxu1 %v691_v56  ;;  %v5801_v56 = vld [vmem:[%s6300_s3] sm:$0xff]  }
 0x212   :  { %3579 = vmatpush1.bf16.msra.mxu0 %v5709_v57  ;;  %3907 = vmatpush1.bf16.msra.mxu1 %v5712_v49  ;;  %v5802_v57 = vld [vmem:[%s6300_s3 + $0x80] sm:$0xff]   ;;  %v5803_v49 = vld [vmem:[%s6300_s3 + $0x48] sm:$0xff]  }
 0x213   :  { %3580 = vmatprep.subr.bf16.mxu0 %v5717_v40  ;;  %3908 = vmatprep.subr.bf16.mxu1 %v5720_v58  ;;  %v5805_v40 = vld [vmem:[%s6300_s3 + $0x8] sm:$0xff]  }
 0x214   :  { %v5806_v58 = vld [vmem:[%s6300_s3 + $0x88] sm:$0xff]  }
 0x216   :  { %3581 = vmatpush1.bf16.msra.mxu0 %v5715_v59  ;;  %3909 = vmatpush1.bf16.msra.mxu1 %v5718_v60  ;;  %v5807_v59 = vld [vmem:[%s6300_s3 + $0x50] sm:$0xff]  }
 0x217   :  { %3582 = vmatprep.subr.bf16.mxu0 %v5723_v50  ;;  %3910 = vmatprep.subr.bf16.mxu1 %v5726_v61  ;;  %v5808_v60 = vld [vmem:[%s6300_s3 + $0xd0] sm:$0xff]  }
 0x218   :  { %v5809_v50 = vld [vmem:[%s6300_s3 + $0x10] sm:$0xff]  }
 0x219   :  { %v5810_v61 = vld [vmem:[%s6300_s3 + $0x90] sm:$0xff]  }
 0x21a   :  { %3583 = vmatpush1.bf16.msra.mxu0 %v5721_v62  ;;  %3911 = vmatpush1.bf16.msra.mxu1 %v5724_v63  ;;  %v5811_v62 = vld [vmem:[%s6300_s3 + $0x58] sm:$0xff]  }
 0x21b   :  { %3584 = vmatprep.subr.bf16.mxu0 %v5729_v0  ;;  %3912 = vmatprep.subr.bf16.mxu1 %v5732_v1  ;;  %v5812_v63 = vld [vmem:[%s6300_s3 + $0xd8] sm:$0xff]  }
 0x21c   :  { %v5813_v0 = vld [vmem:[%s6300_s3 + $0x18] sm:$0xff]  }
 0x21d   :  { %v5814_v1 = vld [vmem:[%s6300_s3 + $0x98] sm:$0xff]  }
 0x21e   :  { %3585 = vmatpush1.bf16.msra.mxu0 %v5727_v2  ;;  %3913 = vmatpush1.bf16.msra.mxu1 %v5730_v3  ;;  %v5815_v2 = vld [vmem:[%s6300_s3 + $0x60] sm:$0xff]  }
 0x21f   :  { %3586 = vmatprep.subr.bf16.mxu0 %v5735_v4  ;;  %3914 = vmatprep.subr.bf16.mxu1 %v5738_v5  ;;  %v5816_v3 = vld [vmem:[%s6300_s3 + $0xe0] sm:$0xff]  }
 0x220   :  { %v5817_v4 = vld [vmem:[%s6300_s3 + $0x20] sm:$0xff]  }
 0x221   :  { %v5818_v5 = vld [vmem:[%s6300_s3 + $0xa0] sm:$0xff]  }
 0x222   :  { %3587 = vmatpush1.bf16.msra.mxu0 %v5733_v6  ;;  %3915 = vmatpush1.bf16.msra.mxu1 %v5736_v7  ;;  %v5819_v6 = vld [vmem:[%s6300_s3 + $0x68] sm:$0xff]  }
 0x223   :  { %3588 = vmatprep.subr.bf16.mxu0 %v5741_v8  ;;  %3916 = vmatprep.subr.bf16.mxu1 %v5744_v9  ;;  %v5820_v7 = vld [vmem:[%s6300_s3 + $0xe8] sm:$0xff]  }
 0x224   :  { %v5821_v8 = vld [vmem:[%s6300_s3 + $0x28] sm:$0xff]  }
 0x225   :  { %v5822_v9 = vld [vmem:[%s6300_s3 + $0xa8] sm:$0xff]  }
 0x226   :  { %3589 = vmatpush1.bf16.msra.mxu0 %v5739_v10  ;;  %3917 = vmatpush1.bf16.msra.mxu1 %v5742_v11  ;;  %v5823_v10 = vld [vmem:[%s6300_s3 + $0x70] sm:$0xff]  }
 0x227   :  { %3590 = vmatprep.subr.bf16.mxu0 %v5747_v12  ;;  %3918 = vmatprep.subr.bf16.mxu1 %v5750_v14  ;;  %v5824_v11 = vld [vmem:[%s6300_s3 + $0xf0] sm:$0xff]  }
 0x228   :  { %v5825_v12 = vld [vmem:[%s6300_s3 + $0x30] sm:$0xff]  }
 0x229   :  { %v5826_v14 = vld [vmem:[%s6300_s3 + $0xb0] sm:$0xff]  }
 0x22a   :  { %3591 = vmatpush1.bf16.msra.mxu0 %v5745_v16  ;;  %3919 = vmatpush1.bf16.msra.mxu1 %v5748_v17  ;;  %v5827_v16 = vld [vmem:[%s6300_s3 + $0x78] sm:$0xff]  }
 0x22b   :  { %3592 = vmatprep.subr.bf16.mxu0 %v5753_v18  ;;  %3920 = vmatprep.subr.bf16.mxu1 %v5756_v19  ;;  %v5828_v17 = vld [vmem:[%s6300_s3 + $0xf8] sm:$0xff]  }
 0x22c   :  { %v5829_v18 = vld [vmem:[%s6300_s3 + $0x38] sm:$0xff]  }
 0x22d   :  { %v5830_v19 = vld [vmem:[%s6300_s3 + $0xb8] sm:$0xff]   ;;  %s5982_s3 = smov 32  }
 0x22e   :  { %3593 = vmatpush1.bf16.msra.mxu0 %v5751_v52  ;;  %3921 = vmatpush1.bf16.msra.mxu1 %v5754_v20  ;;  %v3271_v52 = vsub.s32 0, %v6081_v43  ;;  %v3279_v20 = vsub.s32 2, %v6081_v43 }
 0x22f   :  { %3594 = vmatprep.subr.bf16.mxu0 %v5759_v22  ;;  %3922 = vmatprep.subr.bf16.mxu1 %v5762_v23  ;;  %v591_v22 = vld [vmem:[#allocation5] sm:$0xf]  ;;  %v3275_v23 = vsub.s32 1, %v6081_v43 }
 0x232   :  { %3595 = vmatpush1.bf16.msra.mxu0 %v5757_v24  ;;  %3923 = vmatpush1.bf16.msra.mxu1 %v5760_v26  ;;  %v3283_v24 = vsub.s32 3, %v6081_v43  ;;  %v3272_v26 = vrot.slane %v591_v22, %v3271_v52 }
 0x233   :  { %3596 = vmatprep.subr.bf16.mxu0 %v5765_v13  ;;  %3924 = vmatprep.subr.bf16.mxu1 %v5768_v29  ;;  %v3280_v13 = vrot.slane %v591_v22, %v3279_v20  ;;  %v3276_v29 = vrot.slane %v591_v22, %v3275_v23 }
 0x236   :  { %3597 = vmatpush1.bf16.msra.mxu0 %v5763_v30  ;;  %3925 = vmatpush1.bf16.msra.mxu1 %v5766_v31  ;;  %v3284_v30 = vrot.slane %v591_v22, %v3283_v24 }
 0x237   :  { %3598 = vmatprep.subr.bf16.mxu0 %v5771_v32  ;;  %3926 = vmatprep.subr.bf16.mxu1 %v5774_v15 }
 0x23a   :  { %3599 = vmatpush1.bf16.msra.mxu0 %v5769_v33  ;;  %3927 = vmatpush1.bf16.msra.mxu1 %v5772_v34 }
 0x23b   :  { %3600 = vmatprep.subr.bf16.mxu0 %v5777_v35  ;;  %3928 = vmatprep.subr.bf16.mxu1 %v5780_v25 }
 0x23e   :  { %3601 = vmatpush1.bf16.msra.mxu0 %v5775_v37  ;;  %3929 = vmatpush1.bf16.msra.mxu1 %v5778_v27 }
 0x23f   :  { %3602 = vmatprep.subr.bf16.mxu0 %v5783_v39  ;;  %3930 = vmatprep.subr.bf16.mxu1 %v5786_v41 }
 0x242   :  { %3603 = vmatpush1.bf16.msra.mxu0 %v5781_v42  ;;  %3931 = vmatpush1.bf16.msra.mxu1 %v5784_v44 }
 0x243   :  { %3604 = vmatprep.subr.bf16.mxu0 %v5789_v28  ;;  %3932 = vmatprep.subr.bf16.mxu1 %v5792_v21 }
 0x246   :  { %3605 = vmatpush1.bf16.msra.mxu0 %v5787_v45  ;;  %3933 = vmatpush1.bf16.msra.mxu1 %v5790_v46 }
 0x247   :  { %3606 = vmatprep.subr.bf16.mxu0 %v5795_v47  ;;  %3934 = vmatprep.subr.bf16.mxu1 %v5798_v48 }
 0x24a   :  { %3607 = vmatpush1.bf16.msra.mxu0 %v5793_v36  ;;  %3935 = vmatpush1.bf16.msra.mxu1 %v5796_v53 }
 0x24b   :  { %4912 = vmatprep.subr.bf16.mxu0 %v5799_v38  ;;  %4934 = vmatprep.subr.bf16.mxu1 %v5800_v54  ;;  %v4017_v38 = vld [vmem:[#allocation7] sm:$0x1] }
 0x24d   :  { %3609 = vmatmul.mubr.bf16.vlgmr.msra.gmra.mrb[0].mxu0 %v689_v55  ;;  %3937 = vmatmul.mubr.bf16.vlgmr.msra.gmra.mrb[0].mxu1 %v689_v55 }
 0x24e   :  { %4913 = vmatpush3.bf16.msra.mxu0 %v5801_v56  ;;  %4935 = vmatpush3.bf16.msra.mxu1 %v5802_v57 }
 0x24f   :  { %4914 = vmatprep.subr.bf16.mxu0 %v5803_v49  ;;  %4936 = vmatprep.subr.bf16.mxu1 %v5804_v51 }
 0x252   :  { %4915 = vmatpush3.bf16.msra.mxu0 %v5805_v40  ;;  %4937 = vmatpush3.bf16.msra.mxu1 %v5806_v58 }
 0x253   :  { %4916 = vmatprep.subr.bf16.mxu0 %v5807_v59  ;;  %4938 = vmatprep.subr.bf16.mxu1 %v5808_v60 }
 0x256   :  { %4917 = vmatpush3.bf16.msra.mxu0 %v5809_v50  ;;  %4939 = vmatpush3.bf16.msra.mxu1 %v5810_v61 }
 0x257   :  { %4918 = vmatprep.subr.bf16.mxu0 %v5811_v62  ;;  %4940 = vmatprep.subr.bf16.mxu1 %v5812_v63 }
 0x25a   :  { %4919 = vmatpush3.bf16.msra.mxu0 %v5813_v0  ;;  %4941 = vmatpush3.bf16.msra.mxu1 %v5814_v1 }
 0x25b   :  { %4920 = vmatprep.subr.bf16.mxu0 %v5815_v2  ;;  %4942 = vmatprep.subr.bf16.mxu1 %v5816_v3 }
 0x25e   :  { %4921 = vmatpush3.bf16.msra.mxu0 %v5817_v4  ;;  %4943 = vmatpush3.bf16.msra.mxu1 %v5818_v5 }
 0x25f   :  { %4922 = vmatprep.subr.bf16.mxu0 %v5819_v6  ;;  %4944 = vmatprep.subr.bf16.mxu1 %v5820_v7  ;;  %v4910_v6 = vld [vmem:[#allocation8] ss:$0 sm:$0xff] }
 0x262   :  { %4923 = vmatpush3.bf16.msra.mxu0 %v5821_v8  ;;  %4945 = vmatpush3.bf16.msra.mxu1 %v5822_v9 }
 0x263   :  { %4924 = vmatprep.subr.bf16.mxu0 %v5823_v10  ;;  %4946 = vmatprep.subr.bf16.mxu1 %v5824_v11 }
 0x266   :  { %4925 = vmatpush3.bf16.msra.mxu0 %v5825_v12  ;;  %4947 = vmatpush3.bf16.msra.mxu1 %v5826_v14 }
 0x267   :  { %4926 = vmatprep.subr.bf16.mxu0 %v5827_v16  ;;  %4948 = vmatprep.subr.bf16.mxu1 %v5828_v17 }
 0x26a   :  { %4927 = vmatpush3.bf16.msra.mxu0 %v5829_v18  ;;  %4949 = vmatpush3.bf16.msra.mxu1 %v5830_v19 }
 0x320   :  { %v3610_v31 = vpop.f32.mrb[0].mxu0  ;;  %v3938_v32 = vpop.f32.mrb[0].mxu1 }
 0x321   :  { %v4956_v15 = vadd.f32 %v3610_v31, %v3272_v26  ;;  %v4958_v33 = vadd.f32 %v3938_v32, %v3280_v13  ;;  %v3612_v34 = vpop.f32.mrb[1].mxu0  ;;  %v3940_v35 = vpop.f32.mrb[1].mxu1 }
 0x322   :  { %v4957_v25 = vadd.f32 %v3612_v34, %v3276_v29  ;;  %v4959_v37 = vadd.f32 %v3940_v35, %v3284_v30  ;;  %v3614_v27 = vpop.f32.mrb[2].mxu0  ;;  %v3942_v39 = vpop.f32.mrb[2].mxu1 }
 0x323   :  { %v3945_v41 = vmax.f32 %v4956_v15, 0.0  ;;  %v3947_v42 = vmax.f32 %v4958_v33, 0.0  ;;  %v3615_v44 = vpop.f32.mrb[3].mxu0  ;;  %v3943_v28 = vpop.f32.mrb[3].mxu1 }
 0x324   :  { %v3946_v21 = vmax.f32 %v4957_v25, 0.0  ;;  %v3948_v43 = vmax.f32 %v4959_v37, 0.0 }
 0x325   :  { %v3949_v47 = vpack.c.bf16 %v3945_v41, %v3945_v41  ;;  %v3951_v48 = vpack.c.bf16 %v3947_v42, %v3947_v42 }
 0x326   :  { %v3950_v45 = vpack.c.bf16 %v3946_v21, %v3946_v21  ;;  %v3952_v46 = vpack.c.bf16 %v3948_v43, %v3948_v43 }
 0x328   :  { %4242 = vmatprep.mubr.bf16.mxu0 %v3950_v45  ;;  %4282 = vmatprep.mubr.bf16.mxu1 %v3952_v46 }
 0x329   :  { %4243 = vmatmul.mubr.bf16.vlgmr.msra.gmra.mrb[4].mxu0 %v3949_v47  ;;  %4283 = vmatmul.mubr.bf16.vlgmr.msra.gmra.mrb[4].mxu1 %v3951_v48 }
 0x3fc   :  { %v4928_v36 = vpop.f32.mrb[4].mxu0  ;;  %v4950_v53 = vpop.f32.mrb[4].mxu1 }
 0x3fd   :  { %v4929_v54 = vpop.f32.mrb[5].mxu0  ;;  %v4951_v55 = vpop.f32.mrb[5].mxu1 }
 0x3fe   :  { %v4930_v56 = vadd.f32 %v4929_v54, %v4928_v36  ;;  %v4952_v57 = vadd.f32 %v4951_v55, %v4950_v53  ;;  %v4931_v49 = vpop.f32.mrb[6].mxu0  ;;  %v4953_v51 = vpop.f32.mrb[6].mxu1 }
 0x3ff   :  { %v4932_v40 = vpop.f32.mrb[7].mxu0  ;;  %v4954_v58 = vpop.f32.mrb[7].mxu1 }
 0x400   :  { %v4245_v59 = vadd.f32 %v4930_v56, %v4017_v38 }
 0x402   :  { %v4285_v60 = vadd.f32 %v4952_v57, %v4245_v59 }
 0x404   :  { %v4310_v50 = vmul.f32 %v4285_v60, %v4285_v60  ;;  %v4290_v61 = vmul.f32 1.442695, %v4285_v60 }
 0x406   :  { %4312 = vrot.lane.b32.xlu0 %v4310_v50, %s5982_s3  ;;  %5831 = vpow2.f32 %v4290_v61 }
 0x410   :  { %v5832_v62 = vpop.eup %5831 }
 0x411   :  { %v4309_v63 = vmul.f32 %v5832_v62, %v5832_v62 }
 0x478   :  { %v4313_v0 = vpop.permute.xlu0 %4312 }
 0x479   :  { %v4315_v1 = vadd.f32 %v4313_v0, %v4309_v63 }
 0x47b   :  { %v4316_v2 = vsub.f32 %v4315_v1, %v4285_v60 }
 0x47d   :  { %v4911_v3 = vadd.f32 -0.5, %v4316_v2 }
 0x47f   :  { %4319 = vrot.lane.b32.xlu0 %v4911_v3, %s5983_s14 }
 0x4f1   :  { %v4320_v4 = vpop.permute.xlu0 %4319 }
 0x4f2   :  { %v4322_v5 = vsel %vm4307_vm0, %v4320_v4, 0.0 }
 0x4f3   :  { %4323 = vadd.xlane.f32.xlu1 %v4322_v5 }
 0x504   :  { %4298 = vrot.lane.b32.xlu1 %v4910_v6, %s5982_s3 }
 0x580   :  { %v4324_v7 = vpop.xlane.xlu1 %4323 }
 0x581   :  { %v4325_v8 = vrot.slane %v4324_v7, 4 }
 0x583   :  { %v4326_v9 = vadd.f32 %v4325_v8, %v4324_v7 }
 0x584   :  { %v4299_v10 = vpop.permute.xlu1 %4298 }
 0x585   :  { %v4327_v11 = vrot.slane %v4326_v9, 2  ;;  %v4301_v12 = vmul.f32 %v5832_v62, %v4299_v10 }
 0x587   :  { %4303 = vrot.lane.b32.xlu0 %v4301_v12, %s5983_s14  ;;  %v4328_v14 = vadd.f32 %v4327_v11, %v4326_v9 }
 0x589   :  { %v4329_v16 = vrot.slane %v4328_v14, 1 }
 0x58b   :  { %v4330_v17 = vadd.f32 %v4329_v16, %v4328_v14 }
 0x58d   :  { %5016 = vpush %v4330_v17 }
 0x5be   :  { %s5017_s15 = spop %5016 }
 0x5bf   :  { %v4332_v18 = vstv %s5017_s15 }
 0x5c0   :  { %4334 = vst.msk [vmem:[#allocation11] sm:$0x1] %vm4333_vm1, %v4332_v18 }
 0x5c1   :  { %5932 = shalt.err (!%p5929_p8)
}
 0x5c2   :  { %s5933_s20 = scalar_lea.hbm %s6304_s7, 16 }
 0x5c3   :  { %p5934_p9 = scmp.ne.s32.totalorder %s6304_s7, %s5933_s20  ;;  %p5937_p10 = scmp.lt.u32.totalorder %s5933_s20, %s6304_s7 }
 0x5c5   :  { %p5939_p11 = pnand %p5937_p10, %p5934_p9 }
 0x5c7   :  { %5942 = shalt.err (!%p5939_p11)
}
 0x5c8   :  { %4354 = dma.vmem_to_hbm [thread:$0]  %s4352_s27, 16, %s6304_s7, [#allocation12]  }
 0x5c9   :  { %s5985_s25 = smov [#allocation10]  }
 0x5ca   :  { %s4341_s5 = sshll.u32 %s5985_s25, 4  ;;  %s4342_s5 = int_to_ptr.vmem [resolvable:$true] %s4341_s5 }
 0x5cb   :  { %s5943_s26 = scalar_lea.vmem %s4342_s5, 16  ;;  %s5947_s28 = scalar_lea.vmem %s4342_s5, 32 }
 0x5cc   :  { %p5944_p12 = scmp.ne.s32.totalorder %s4342_s5, %s5943_s26  ;;  %p5948_p13 = scmp.lt.s32.totalorder %s4342_s5, %s4342_s5 }
 0x5cd   :  { %p5949_p0 = scmp.lt.s32.totalorder %s5947_s28, %s5943_s26 }
 0x5cf   :  { %p5950_p1 = por %p5949_p0, %p5948_p13 }
 0x5d1   :  { %p5951_p2 = pnand %p5950_p1, %p5944_p12 }
 0x5f9   :  { %v4304_v19 = vpop.permute.xlu0 %4303 }
 0x5fa   :  { %v4306_v52 = vadd.f32 %v4304_v19, %v4285_v60 }
 0x5fc   :  { %4308 = vst.msk [vmem:[#allocation10] sm:$0x1] %vm4307_vm0, %v4306_v52 }
 0x5fd   :  { %5954 = shalt.err (!%p5951_p2)
}
 0x5fe   :  { %s5955_s30 = scalar_lea.hbm %s6303_s6, 16 }
 0x5ff   :  { %p5956_p3 = scmp.ne.s32.totalorder %s6303_s6, %s5955_s30  ;;  %p5959_p4 = scmp.lt.u32.totalorder %s5955_s30, %s6303_s6 }
 0x601   :  { %p5961_p5 = pnand %p5959_p4, %p5956_p3 }
 0x603   :  { %5964 = shalt.err (!%p5961_p5)
}
 0x604   :  { %4344 = dma.vmem_to_hbm [thread:$0]  %s4342_s5, 16, %s6303_s6, [#allocation4]  }
 0x605   :  { %5971 = dma.done.wait [#allocation4], 16  }
 0x606   :  { %5972 = vsyncadd [#allocation4], 4294967280 }
 0x607   :  { %5973 = dma.done.wait [#allocation12], 16  }
 0x608   :  { %5974 = vsyncadd [#allocation12], 4294967280 }
 0x609   :  { %4361 = vsyncpa [#allocation3], 1 }
 0x60a   :  { %4362 = vsyncpa [#allocation6], 1 }
 0x60b   :  { %4363 = vsyncpa [#allocation9], 1 }
 0x60c   :  { %4364 = vsyncpa [#allocation4], 1 }
 0x60d   :  { %4365 = vsyncpa [#allocation12], 1 }

</bundles_post_ra>
